<compile_context>
chip_gen: v6e
topology: v6e:2x2x1
jax: 0.10.0
libtpu: 0.0.40
codegen_flags: <defaults>
</compile_context>

<pallas_src>
import functools

import jax
import jax.numpy as jnp
from jax.experimental import pallas as pl
from jax.experimental.pallas import tpu as pltpu

EPS = 1e-5
MICRO_BATCH = 256  # rows per grid step == one independent BN batch / module call

# Row indices inside the packed per-feature-vector operand (10, n_neurons).
_ROW_B1, _ROW_G1, _ROW_BE1 = 0, 1, 2
_ROW_B2, _ROW_G2, _ROW_BE2 = 3, 4, 5
_ROW_B3, _ROW_G3, _ROW_BE3 = 6, 7, 8
_ROW_BO = 9
_N_VEC_ROWS = 10


def nnmnist_kernel(x_ref, w1_ref, w2_ref, w3_ref, wo_ref, vecs_ref, o_ref, *,
                   n_neurons, out_pad):
    """One micro-batch forward: (Linear -> ReLU -> BN) x3, then Linear.

    x_ref:  (MB, in)      f32   (cast to bf16 in-kernel)
    wN_ref: (in, out)     bf16  (wo zero-padded to out_pad columns)
    vecs:   (10, F)       f32   packed biases / BN gammas / BN betas / output bias
    o_ref:  (MB, out_pad) f32   lane-dense output block
    """
    vecs = vecs_ref[...]

    def row(r, width):
        return vecs[r:r + 1, :width]      # (1, width) f32, broadcasts over the batch

    def layer(h_bf16, w_ref, r0):
        b = row(r0, n_neurons)
        g = row(r0 + 1, n_neurons)
        be = row(r0 + 2, n_neurons)
        # Linear: bf16 MXU operands, f32 accumulation.
        z = jnp.dot(h_bf16, w_ref[...], preferred_element_type=jnp.float32) + b
        a = jnp.maximum(z, 0.0)
        # Train-mode BatchNorm1d, one-pass biased stats: var = E[a^2] - mean^2.
        mu = jnp.mean(a, axis=0, keepdims=True)
        msq = jnp.mean(a * a, axis=0, keepdims=True)
        var = jnp.maximum(msq - mu * mu, 0.0)
        s = jax.lax.rsqrt(var + EPS) * g          # folded scale
        t = be - mu * s                           # folded shift
        # Next consumer is a bf16 MXU matmul -> hand back bf16 directly.
        return (a * s + t).astype(jnp.bfloat16)

    h = layer(x_ref[...].astype(jnp.bfloat16), w1_ref, _ROW_B1)
    h = layer(h, w2_ref, _ROW_B2)
    h = layer(h, w3_ref, _ROW_B3)

    bo = row(_ROW_BO, out_pad)
    # TODO(synk): emit bf16 logits instead if downstream consumers accept bf16.
    o_ref[...] = jnp.dot(h, wo_ref[...], preferred_element_type=jnp.float32) + bo


def pack_params(params):
    """One-time parameter prep (keep OUT of the per-call jitted path):
    bf16 weights, zero-padded lane-dense output weight, and the 10 per-feature
    vectors packed into a single (10, n_neurons) f32 operand."""
    n_neurons = params["w1"].shape[1]
    out_dim = params["wo"].shape[1]
    out_pad = 128 * pl.cdiv(out_dim, 128)
    # Simple packing scheme assumes the hidden width is lane-aligned and at least
    # as wide as the padded output (true for typical MLP sizes).
    assert n_neurons % 128 == 0 and out_pad <= n_neurons

    def vrow(v):
        v = v.astype(jnp.float32)
        return jnp.pad(v, ((0, 0), (0, n_neurons - v.shape[1])))

    vecs = jnp.concatenate(
        [vrow(params["b1"]), vrow(params["g1"]), vrow(params["be1"]),
         vrow(params["b2"]), vrow(params["g2"]), vrow(params["be2"]),
         vrow(params["b3"]), vrow(params["g3"]), vrow(params["be3"]),
         vrow(params["bo"])], axis=0)                  # (10, F)
    assert vecs.shape == (_N_VEC_ROWS, n_neurons)

    return dict(
        w1=params["w1"].astype(jnp.bfloat16),
        w2=params["w2"].astype(jnp.bfloat16),
        w3=params["w3"].astype(jnp.bfloat16),
        wo=jnp.pad(params["wo"],
                   ((0, 0), (0, out_pad - out_dim))).astype(jnp.bfloat16),
        vecs=vecs,
    )


@functools.partial(jax.jit, static_argnames=("out_dim",))
def nnmnist_forward(x, packed, *, out_dim):
    """x: (B, in) f32, B a multiple of the micro-batch; packed: from pack_params()."""
    B, in_dim = x.shape
    n_neurons = packed["w1"].shape[1]
    out_pad = packed["wo"].shape[1]

    micro = min(MICRO_BATCH, B)
    assert B % micro == 0, "batch must be a multiple of the micro-batch size"
    n_blocks = B // micro

    grid_spec = pltpu.PrefetchScalarGridSpec(
        num_scalar_prefetch=0,
        grid=(n_blocks,),
        in_specs=[
            pl.BlockSpec((micro, in_dim), lambda i: (i, 0)),           # x per step
            pl.BlockSpec((in_dim, n_neurons), lambda i: (0, 0)),       # weights stay
            pl.BlockSpec((n_neurons, n_neurons), lambda i: (0, 0)),    # VMEM-resident
            pl.BlockSpec((n_neurons, n_neurons), lambda i: (0, 0)),
            pl.BlockSpec((n_neurons, out_pad), lambda i: (0, 0)),
            pl.BlockSpec((_N_VEC_ROWS, n_neurons), lambda i: (0, 0)),
        ],
        out_specs=pl.BlockSpec((micro, out_pad), lambda i: (i, 0)),
    )

    out_padded = pl.pallas_call(
        functools.partial(nnmnist_kernel, n_neurons=n_neurons, out_pad=out_pad),
        out_shape=jax.ShapeDtypeStruct((B, out_pad), jnp.float32),
        grid_spec=grid_spec,
        compiler_params=pltpu.CompilerParams(
            dimension_semantics=("parallel",)),
    )(x, packed["w1"], packed["w2"], packed["w3"], packed["wo"], packed["vecs"])

    return out_padded[:, :out_dim]


def init_params(key, input_size, output_size, n_neurons):
    """nn.Linear-style init (uniform +-1/sqrt(fan_in)), BN gamma=1 / beta=0.
    Linear weights stored as [in, out]."""
    ks = jax.random.split(key, 8)

    def linear_init(kw, kb, fan_in, fan_out):
        bound = 1.0 / jnp.sqrt(fan_in)
        w = jax.random.uniform(kw, (fan_in, fan_out), jnp.float32, -bound, bound)
        b = jax.random.uniform(kb, (1, fan_out), jnp.float32, -bound, bound)
        return w, b

    w1, b1 = linear_init(ks[0], ks[1], input_size, n_neurons)
    w2, b2 = linear_init(ks[2], ks[3], n_neurons, n_neurons)
    w3, b3 = linear_init(ks[4], ks[5], n_neurons, n_neurons)
    wo, bo = linear_init(ks[6], ks[7], n_neurons, output_size)

    ones = jnp.ones((1, n_neurons), jnp.float32)
    zeros = jnp.zeros((1, n_neurons), jnp.float32)

    return dict(w1=w1, b1=b1, g1=ones, be1=zeros,
                w2=w2, b2=b2, g2=ones, be2=zeros,
                w3=w3, b3=b3, g3=ones, be3=zeros,
                wo=wo, bo=bo)


def reference_forward(x, p, micro_batch):
    """Pure-JAX reference matching the kernel numerics: bf16 MXU operands,
    bf16 inter-layer activations, f32 train-mode BN per micro-batch."""
    def mm(h, w):
        return jnp.dot(h.astype(jnp.bfloat16), w.astype(jnp.bfloat16),
                       preferred_element_type=jnp.float32)

    def bn(h, g, b):
        mu = jnp.mean(h, axis=0, keepdims=True)
        var = jnp.mean((h - mu) ** 2, axis=0, keepdims=True)
        return ((h - mu) / jnp.sqrt(var + EPS) * g + b).astype(jnp.bfloat16)

    def one_batch(xb):
        h = jax.nn.relu(mm(xb, p["w1"]) + p["b1"]); h = bn(h, p["g1"], p["be1"])
        h = jax.nn.relu(mm(h, p["w2"]) + p["b2"]); h = bn(h, p["g2"], p["be2"])
        h = jax.nn.relu(mm(h, p["w3"]) + p["b3"]); h = bn(h, p["g3"], p["be3"])
        return mm(h, p["wo"]) + p["bo"]

    B = x.shape[0]
    outs = [one_batch(x[i:i + micro_batch]) for i in range(0, B, micro_batch)]
    return jnp.concatenate(outs, axis=0)


if __name__ == "__main__":
    INPUT_SIZE, N_NEURONS, OUTPUT_SIZE = 128, 128, 16
    N_MICRO_BATCHES = 2
    B = N_MICRO_BATCHES * MICRO_BATCH      # 512 rows -> grid=(2,), parallel axis

    key = jax.random.PRNGKey(0)
    kx, kp = jax.random.split(key)
    x = jax.random.normal(kx, (B, INPUT_SIZE), jnp.float32)

    params = init_params(kp, INPUT_SIZE, OUTPUT_SIZE, N_NEURONS)
    packed = pack_params(params)           # one-time prep, outside the hot path

    out = jax.block_until_ready(nnmnist_forward(x, packed, out_dim=OUTPUT_SIZE))

    ref = reference_forward(x, params, MICRO_BATCH)
    assert out.shape == (B, OUTPUT_SIZE)
    assert jnp.allclose(out, ref, atol=3e-2, rtol=3e-2), "mismatch vs JAX reference"

    print("KERNEL_OK")
</pallas_src>

<mosaic_0001>
module attributes {stable_mosaic.version = 11 : i64} {
  func.func @nnmnist_kernel(%arg0: i32, %arg1: memref<256x128xf32, #tpu.memory_space<vmem>>, %arg2: memref<128x128xbf16, #tpu.memory_space<vmem>>, %arg3: memref<128x128xbf16, #tpu.memory_space<vmem>>, %arg4: memref<128x128xbf16, #tpu.memory_space<vmem>>, %arg5: memref<128x128xbf16, #tpu.memory_space<vmem>>, %arg6: memref<10x128xf32, #tpu.memory_space<vmem>>, %arg7: memref<256x128xf32, #tpu.memory_space<vmem>>) attributes {dimension_semantics = [#tpu.dimension_semantics<parallel>], iteration_bounds = array<i64: 2>, scalar_prefetch = 0 : i64, scratch_operands = 0 : i64, tpu.core_type = #tpu.core_type<tc>, window_params = [{transform_indices = @transform_0, window_bounds = array<i64: 256, 128>}, {pipeline_mode = #tpu.pipeline_mode<synchronous>, transform_indices = @transform_1, window_bounds = array<i64: 128, 128>}, {pipeline_mode = #tpu.pipeline_mode<synchronous>, transform_indices = @transform_2, window_bounds = array<i64: 128, 128>}, {pipeline_mode = #tpu.pipeline_mode<synchronous>, transform_indices = @transform_3, window_bounds = array<i64: 128, 128>}, {pipeline_mode = #tpu.pipeline_mode<synchronous>, transform_indices = @transform_4, window_bounds = array<i64: 128, 128>}, {pipeline_mode = #tpu.pipeline_mode<synchronous>, transform_indices = @transform_5, window_bounds = array<i64: 10, 128>}, {transform_indices = @transform_6, window_bounds = array<i64: 256, 128>}]} {
    %c0 = arith.constant 0 : index
    %c0_0 = arith.constant 0 : index
    %0 = vector.load %arg6[%c0, %c0_0] : memref<10x128xf32, #tpu.memory_space<vmem>>, vector<10x128xf32>
    %c0_1 = arith.constant 0 : index
    %c0_2 = arith.constant 0 : index
    %1 = vector.load %arg1[%c0_1, %c0_2] : memref<256x128xf32, #tpu.memory_space<vmem>>, vector<256x128xf32>
    %2 = arith.truncf %1 : vector<256x128xf32> to vector<256x128xbf16>
    %3 = vector.extract_strided_slice %0 {offsets = [0, 0], sizes = [1, 128], strides = [1, 1]} : vector<10x128xf32> to vector<1x128xf32>
    %4 = vector.extract_strided_slice %0 {offsets = [1, 0], sizes = [1, 128], strides = [1, 1]} : vector<10x128xf32> to vector<1x128xf32>
    %5 = vector.extract_strided_slice %0 {offsets = [2, 0], sizes = [1, 128], strides = [1, 1]} : vector<10x128xf32> to vector<1x128xf32>
    %c0_3 = arith.constant 0 : index
    %c0_4 = arith.constant 0 : index
    %6 = vector.load %arg2[%c0_3, %c0_4] : memref<128x128xbf16, #tpu.memory_space<vmem>>, vector<128x128xbf16>
    %cst = arith.constant dense<0.000000e+00> : vector<256x128xf32>
    %7 = tpu.matmul %2, %6, %cst {dimension_numbers = #tpu.dot_dimension_numbers<[1], [0], [0], [1], [0, 0, 1, 1], [], []>} : vector<256x128xbf16>, vector<128x128xbf16>, vector<256x128xf32> -> vector<256x128xf32>
    %8 = vector.broadcast %3 : vector<1x128xf32> to vector<256x128xf32>
    %9 = arith.addf %7, %8 : vector<256x128xf32>
    %cst_5 = arith.constant 0.000000e+00 : f32
    %10 = vector.broadcast %cst_5 : f32 to vector<256x128xf32>
    %11 = arith.maximumf %9, %10 : vector<256x128xf32>
    %cst_6 = arith.constant dense<0.000000e+00> : vector<128xf32>
    %12 = vector.multi_reduction <add>, %11, %cst_6 [0] : vector<256x128xf32> to vector<128xf32>
    %13 = vector.shape_cast %12 : vector<128xf32> to vector<1x128xf32>
    %cst_7 = arith.constant 2.560000e+02 : f32
    %14 = vector.broadcast %cst_7 : f32 to vector<1x128xf32>
    %15 = arith.divf %13, %14 : vector<1x128xf32>
    %16 = arith.mulf %11, %11 : vector<256x128xf32>
    %cst_8 = arith.constant dense<0.000000e+00> : vector<128xf32>
    %17 = vector.multi_reduction <add>, %16, %cst_8 [0] : vector<256x128xf32> to vector<128xf32>
    %18 = vector.shape_cast %17 : vector<128xf32> to vector<1x128xf32>
    %cst_9 = arith.constant 2.560000e+02 : f32
    %19 = vector.broadcast %cst_9 : f32 to vector<1x128xf32>
    %20 = arith.divf %18, %19 : vector<1x128xf32>
    %21 = arith.mulf %15, %15 : vector<1x128xf32>
    %22 = arith.subf %20, %21 : vector<1x128xf32>
    %cst_10 = arith.constant 0.000000e+00 : f32
    %23 = vector.broadcast %cst_10 : f32 to vector<1x128xf32>
    %24 = arith.maximumf %22, %23 : vector<1x128xf32>
    %cst_11 = arith.constant 9.99999974E-6 : f32
    %25 = vector.broadcast %cst_11 : f32 to vector<1x128xf32>
    %26 = arith.addf %24, %25 : vector<1x128xf32>
    %27 = math.rsqrt %26 : vector<1x128xf32>
    %28 = arith.mulf %27, %4 : vector<1x128xf32>
    %29 = arith.mulf %15, %28 : vector<1x128xf32>
    %30 = arith.subf %5, %29 : vector<1x128xf32>
    %31 = vector.broadcast %28 : vector<1x128xf32> to vector<256x128xf32>
    %32 = arith.mulf %11, %31 : vector<256x128xf32>
    %33 = vector.broadcast %30 : vector<1x128xf32> to vector<256x128xf32>
    %34 = arith.addf %32, %33 : vector<256x128xf32>
    %35 = arith.truncf %34 : vector<256x128xf32> to vector<256x128xbf16>
    %36 = vector.extract_strided_slice %0 {offsets = [3, 0], sizes = [1, 128], strides = [1, 1]} : vector<10x128xf32> to vector<1x128xf32>
    %37 = vector.extract_strided_slice %0 {offsets = [4, 0], sizes = [1, 128], strides = [1, 1]} : vector<10x128xf32> to vector<1x128xf32>
    %38 = vector.extract_strided_slice %0 {offsets = [5, 0], sizes = [1, 128], strides = [1, 1]} : vector<10x128xf32> to vector<1x128xf32>
    %c0_12 = arith.constant 0 : index
    %c0_13 = arith.constant 0 : index
    %39 = vector.load %arg3[%c0_12, %c0_13] : memref<128x128xbf16, #tpu.memory_space<vmem>>, vector<128x128xbf16>
    %cst_14 = arith.constant dense<0.000000e+00> : vector<256x128xf32>
    %40 = tpu.matmul %35, %39, %cst_14 {dimension_numbers = #tpu.dot_dimension_numbers<[1], [0], [0], [1], [0, 0, 1, 1], [], []>} : vector<256x128xbf16>, vector<128x128xbf16>, vector<256x128xf32> -> vector<256x128xf32>
    %41 = vector.broadcast %36 : vector<1x128xf32> to vector<256x128xf32>
    %42 = arith.addf %40, %41 : vector<256x128xf32>
    %cst_15 = arith.constant 0.000000e+00 : f32
    %43 = vector.broadcast %cst_15 : f32 to vector<256x128xf32>
    %44 = arith.maximumf %42, %43 : vector<256x128xf32>
    %cst_16 = arith.constant dense<0.000000e+00> : vector<128xf32>
    %45 = vector.multi_reduction <add>, %44, %cst_16 [0] : vector<256x128xf32> to vector<128xf32>
    %46 = vector.shape_cast %45 : vector<128xf32> to vector<1x128xf32>
    %cst_17 = arith.constant 2.560000e+02 : f32
    %47 = vector.broadcast %cst_17 : f32 to vector<1x128xf32>
    %48 = arith.divf %46, %47 : vector<1x128xf32>
    %49 = arith.mulf %44, %44 : vector<256x128xf32>
    %cst_18 = arith.constant dense<0.000000e+00> : vector<128xf32>
    %50 = vector.multi_reduction <add>, %49, %cst_18 [0] : vector<256x128xf32> to vector<128xf32>
    %51 = vector.shape_cast %50 : vector<128xf32> to vector<1x128xf32>
    %cst_19 = arith.constant 2.560000e+02 : f32
    %52 = vector.broadcast %cst_19 : f32 to vector<1x128xf32>
    %53 = arith.divf %51, %52 : vector<1x128xf32>
    %54 = arith.mulf %48, %48 : vector<1x128xf32>
    %55 = arith.subf %53, %54 : vector<1x128xf32>
    %cst_20 = arith.constant 0.000000e+00 : f32
    %56 = vector.broadcast %cst_20 : f32 to vector<1x128xf32>
    %57 = arith.maximumf %55, %56 : vector<1x128xf32>
    %cst_21 = arith.constant 9.99999974E-6 : f32
    %58 = vector.broadcast %cst_21 : f32 to vector<1x128xf32>
    %59 = arith.addf %57, %58 : vector<1x128xf32>
    %60 = math.rsqrt %59 : vector<1x128xf32>
    %61 = arith.mulf %60, %37 : vector<1x128xf32>
    %62 = arith.mulf %48, %61 : vector<1x128xf32>
    %63 = arith.subf %38, %62 : vector<1x128xf32>
    %64 = vector.broadcast %61 : vector<1x128xf32> to vector<256x128xf32>
    %65 = arith.mulf %44, %64 : vector<256x128xf32>
    %66 = vector.broadcast %63 : vector<1x128xf32> to vector<256x128xf32>
    %67 = arith.addf %65, %66 : vector<256x128xf32>
    %68 = arith.truncf %67 : vector<256x128xf32> to vector<256x128xbf16>
    %69 = vector.extract_strided_slice %0 {offsets = [6, 0], sizes = [1, 128], strides = [1, 1]} : vector<10x128xf32> to vector<1x128xf32>
    %70 = vector.extract_strided_slice %0 {offsets = [7, 0], sizes = [1, 128], strides = [1, 1]} : vector<10x128xf32> to vector<1x128xf32>
    %71 = vector.extract_strided_slice %0 {offsets = [8, 0], sizes = [1, 128], strides = [1, 1]} : vector<10x128xf32> to vector<1x128xf32>
    %c0_22 = arith.constant 0 : index
    %c0_23 = arith.constant 0 : index
    %72 = vector.load %arg4[%c0_22, %c0_23] : memref<128x128xbf16, #tpu.memory_space<vmem>>, vector<128x128xbf16>
    %cst_24 = arith.constant dense<0.000000e+00> : vector<256x128xf32>
    %73 = tpu.matmul %68, %72, %cst_24 {dimension_numbers = #tpu.dot_dimension_numbers<[1], [0], [0], [1], [0, 0, 1, 1], [], []>} : vector<256x128xbf16>, vector<128x128xbf16>, vector<256x128xf32> -> vector<256x128xf32>
    %74 = vector.broadcast %69 : vector<1x128xf32> to vector<256x128xf32>
    %75 = arith.addf %73, %74 : vector<256x128xf32>
    %cst_25 = arith.constant 0.000000e+00 : f32
    %76 = vector.broadcast %cst_25 : f32 to vector<256x128xf32>
    %77 = arith.maximumf %75, %76 : vector<256x128xf32>
    %cst_26 = arith.constant dense<0.000000e+00> : vector<128xf32>
    %78 = vector.multi_reduction <add>, %77, %cst_26 [0] : vector<256x128xf32> to vector<128xf32>
    %79 = vector.shape_cast %78 : vector<128xf32> to vector<1x128xf32>
    %cst_27 = arith.constant 2.560000e+02 : f32
    %80 = vector.broadcast %cst_27 : f32 to vector<1x128xf32>
    %81 = arith.divf %79, %80 : vector<1x128xf32>
    %82 = arith.mulf %77, %77 : vector<256x128xf32>
    %cst_28 = arith.constant dense<0.000000e+00> : vector<128xf32>
    %83 = vector.multi_reduction <add>, %82, %cst_28 [0] : vector<256x128xf32> to vector<128xf32>
    %84 = vector.shape_cast %83 : vector<128xf32> to vector<1x128xf32>
    %cst_29 = arith.constant 2.560000e+02 : f32
    %85 = vector.broadcast %cst_29 : f32 to vector<1x128xf32>
    %86 = arith.divf %84, %85 : vector<1x128xf32>
    %87 = arith.mulf %81, %81 : vector<1x128xf32>
    %88 = arith.subf %86, %87 : vector<1x128xf32>
    %cst_30 = arith.constant 0.000000e+00 : f32
    %89 = vector.broadcast %cst_30 : f32 to vector<1x128xf32>
    %90 = arith.maximumf %88, %89 : vector<1x128xf32>
    %cst_31 = arith.constant 9.99999974E-6 : f32
    %91 = vector.broadcast %cst_31 : f32 to vector<1x128xf32>
    %92 = arith.addf %90, %91 : vector<1x128xf32>
    %93 = math.rsqrt %92 : vector<1x128xf32>
    %94 = arith.mulf %93, %70 : vector<1x128xf32>
    %95 = arith.mulf %81, %94 : vector<1x128xf32>
    %96 = arith.subf %71, %95 : vector<1x128xf32>
    %97 = vector.broadcast %94 : vector<1x128xf32> to vector<256x128xf32>
    %98 = arith.mulf %77, %97 : vector<256x128xf32>
    %99 = vector.broadcast %96 : vector<1x128xf32> to vector<256x128xf32>
    %100 = arith.addf %98, %99 : vector<256x128xf32>
    %101 = arith.truncf %100 : vector<256x128xf32> to vector<256x128xbf16>
    %102 = vector.extract_strided_slice %0 {offsets = [9, 0], sizes = [1, 128], strides = [1, 1]} : vector<10x128xf32> to vector<1x128xf32>
    %c0_32 = arith.constant 0 : index
    %c0_33 = arith.constant 0 : index
    %103 = vector.load %arg5[%c0_32, %c0_33] : memref<128x128xbf16, #tpu.memory_space<vmem>>, vector<128x128xbf16>
    %cst_34 = arith.constant dense<0.000000e+00> : vector<256x128xf32>
    %104 = tpu.matmul %101, %103, %cst_34 {dimension_numbers = #tpu.dot_dimension_numbers<[1], [0], [0], [1], [0, 0, 1, 1], [], []>} : vector<256x128xbf16>, vector<128x128xbf16>, vector<256x128xf32> -> vector<256x128xf32>
    %105 = vector.broadcast %102 : vector<1x128xf32> to vector<256x128xf32>
    %106 = arith.addf %104, %105 : vector<256x128xf32>
    %c0_35 = arith.constant 0 : index
    %c0_36 = arith.constant 0 : index
    %107 = vector.load %arg7[%c0_35, %c0_36] : memref<256x128xf32, #tpu.memory_space<vmem>>, vector<256x128xf32>
    tpu.vector_store %arg7[%c0_35, %c0_36], %106 {strides = array<i32>} : memref<256x128xf32, #tpu.memory_space<vmem>>, vector<256x128xf32>,
    return
  }
  func.func @transform_0(%arg0: i32) -> (i32, i32) {
    %c0_i32 = arith.constant 0 : i32
    %c0_i32_0 = arith.constant 0 : i32
    return %arg0, %c0_i32 : i32, i32
  }
  func.func @transform_1(%arg0: i32) -> (i32, i32) {
    %c0_i32 = arith.constant 0 : i32
    %c0_i32_0 = arith.constant 0 : i32
    %c0_i32_1 = arith.constant 0 : i32
    return %c0_i32, %c0_i32_0 : i32, i32
  }
  func.func @transform_2(%arg0: i32) -> (i32, i32) {
    %c0_i32 = arith.constant 0 : i32
    %c0_i32_0 = arith.constant 0 : i32
    %c0_i32_1 = arith.constant 0 : i32
    return %c0_i32, %c0_i32_0 : i32, i32
  }
  func.func @transform_3(%arg0: i32) -> (i32, i32) {
    %c0_i32 = arith.constant 0 : i32
    %c0_i32_0 = arith.constant 0 : i32
    %c0_i32_1 = arith.constant 0 : i32
    return %c0_i32, %c0_i32_0 : i32, i32
  }
  func.func @transform_4(%arg0: i32) -> (i32, i32) {
    %c0_i32 = arith.constant 0 : i32
    %c0_i32_0 = arith.constant 0 : i32
    %c0_i32_1 = arith.constant 0 : i32
    return %c0_i32, %c0_i32_0 : i32, i32
  }
  func.func @transform_5(%arg0: i32) -> (i32, i32) {
    %c0_i32 = arith.constant 0 : i32
    %c0_i32_0 = arith.constant 0 : i32
    %c0_i32_1 = arith.constant 0 : i32
    return %c0_i32, %c0_i32_0 : i32, i32
  }
  func.func @transform_6(%arg0: i32) -> (i32, i32) {
    %c0_i32 = arith.constant 0 : i32
    %c0_i32_0 = arith.constant 0 : i32
    return %arg0, %c0_i32 : i32, i32
  }
}

</mosaic_0001>

<bundles_post_ra>
// kernel: nnmnist_forward.1
= control target key start
LH: loop header
LB: loop body
LE: loop exit
PB: predicated region body
PF: predicated region fallthrough
CT: control target
= control target key end

     0   :  { %11 = vsyncpa [#allocation3], 0  ;;  %s4152_s0 = inlined_call_operand.hbm [shape: f32[512,128], index: 0, kind: input, shape index: {}]   ;;  %s4153_s1 = inlined_call_operand.hbm [shape: bf16[128,128], index: 1, kind: input, shape index: {}]   ;;  %s4154_s2 = inlined_call_operand.hbm [shape: bf16[128,128], index: 2, kind: input, shape index: {}]   ;;  %s4155_s3 = inlined_call_operand.hbm [shape: bf16[128,128], index: 3, kind: input, shape index: {}]   ;;  %s4156_s4 = inlined_call_operand.hbm [shape: bf16[128,128], index: 4, kind: input, shape index: {}]   ;;  %s4157_s5 = inlined_call_operand.hbm [shape: f32[10,128], index: 5, kind: input, shape index: {}]   ;;  %s4158_s6 = inlined_call_operand.vmem [shape: f32[512,128], index: 6, kind: output, shape index: {}]  }
   0x1   :  { %13 = vsyncpa [#allocation3 + $0x1], 0 }
   0x2   :  { %14 = vsyncpa [#allocation5], 0 }
   0x3   :  { %15 = vsyncpa [#allocation8], 0 }
   0x4   :  { %16 = vsyncpa [#allocation11], 0  ;;  %s2907_s21 = smov 0   ;;  %s2909_s22 = smov 0  }
   0x5   :  { %s2911_s23 = smov 0   ;;  %s2913_s24 = smov 0  }
   0x6 LB: > { %s2862_s25 = smov [#allocation4]   ;;  %s2179_s27 = sadd.s32 4294967295, %s2860_s24   ;;  %s2860_s24 = sphi %s2913_s24, %s4175_s24   ;;  %s2856_s23 = sphi %s2911_s23, %s4174_s23   ;;  %s2852_s22 = sphi %s2909_s22, %s4173_s22   ;;  %s2848_s21 = sphi %s2907_s21, %s4172_s21  }
   0x7   : > { %s196_s26 = sshll.u32 %s2862_s25, 4  ;;  %p2181_p0 = scmp.ge.s32.totalorder %s2860_s24, 1  ;;  %s197_s26 = int_to_ptr.vmem [resolvable:$true] %s196_s26 }
   0x8   : > { %p2931_p1 = scmp.eq.s32.totalorder %s2179_s27, 0  ;;  %p184_p2 = scmp.lt.s32.totalorder %s2860_s24, 3 }
   0x9   : > { %s2863_s30 = smov [#allocation7]   ;;  %s2864_s9 = smov [#allocation6]  }
   0xa   : > { %s4163_s28 = scalar_select %p2931_p1, 1, 0 }
   0xb   : > { %p2936_p3 = pnand %p2181_p0, %p184_p2  ;;  %s222_s7 = sshll.u32 %s2863_s30, 4  ;;  %s2948_s7 = int_to_ptr.vmem [resolvable:$true] %s222_s7 }
   0xc   : > { %s209_s10 = sshll.u32 %s2864_s9, 4  ;;  %s2667_s12 = scalar_lea.vmem %s197_s26, 1024  ;;  %s2950_s10 = int_to_ptr.vmem [resolvable:$true] %s209_s10 }
   0xd   : > { %s4164_s29 = scalar_select %p2936_p3, 1, 0 }
   0xe   : > { %p2545_p4 = pneg %p2936_p3  ;;  %p2668_p7 = scmp.ne.s32.totalorder %s197_s26, %s2667_s12 }
   0xf   : > { %p2675_p10 = scmp.lt.s32.totalorder %s197_s26, %s197_s26  ;;  %p2676_p11 = scmp.lt.s32.totalorder %s2667_s12, %s2667_s12 }
  0x10   : > { %p2944_p5 = pnand %p2545_p4, %p2931_p1 }
  0x11   : > { %p2677_p12 = por %p2676_p11, %p2675_p10 }
  0x12   : > { %p2954_p6 = pneg %p2944_p5 }
  0x14   : > { %p2670_p8 = pnand %p2668_p7, %p2954_p6 }
  0x16   : > { %p2671_p9 = pneg %p2670_p8 }
  0x18   : > { %p2678_p13 = pnand %p2677_p12, %p2671_p9 }
  0x1a   : > { %2681 = shalt.err (!%p2678_p13)
}
  0x1b   : > { %s2865_s13 = smov 64   ;;  %s2866_s14 = smov 4  }
  0x1c   : > { %2548 = dma.hbm_to_vmem [thread:$0]  (!%p2944_p5), %s4153_s1, 1024, %s197_s26, [#allocation5], %s2865_s13, %s2865_s13, %s2866_s14  }
  0x1d   : > { %s2693_s17 = scalar_lea.vmem %s2948_s7, 1024  ;;  %p2701_p7 = scmp.lt.s32.totalorder %s2948_s7, %s2948_s7 }
  0x1e   : > { %p2694_p0 = scmp.ne.s32.totalorder %s2948_s7, %s2693_s17  ;;  %p2702_p8 = scmp.lt.s32.totalorder %s2693_s17, %s2693_s17 }
  0x20   : > { %p2696_p2 = pnand %p2694_p0, %p2954_p6  ;;  %p2703_p9 = por %p2702_p8, %p2701_p7 }
  0x22   : > { %p2697_p4 = pneg %p2696_p2 }
  0x24   : > { %p2704_p10 = pnand %p2703_p9, %p2697_p4 }
  0x26   : > { %2707 = shalt.err (!%p2704_p10)
}
  0x27   : > { %2554 = dma.hbm_to_vmem [thread:$0]  (!%p2944_p5), %s4155_s3, 1024, %s2948_s7, [#allocation8], %s2865_s13, %s2865_s13, %s2866_s14  }
  0x28   : > { %s2719_s20 = scalar_lea.vmem %s2950_s10, 1024  ;;  %p2727_p0 = scmp.lt.s32.totalorder %s2950_s10, %s2950_s10 }
  0x29   : > { %p2720_p11 = scmp.ne.s32.totalorder %s2950_s10, %s2719_s20  ;;  %p2728_p2 = scmp.lt.s32.totalorder %s2719_s20, %s2719_s20 }
  0x2b   : > { %p2722_p12 = pnand %p2720_p11, %p2954_p6  ;;  %p2729_p4 = por %p2728_p2, %p2727_p0 }
  0x2d   : > { %p2723_p13 = pneg %p2722_p12 }
  0x2f   : > { %p2730_p7 = pnand %p2729_p4, %p2723_p13 }
  0x31   : > { %2733 = shalt.err (!%p2730_p7)
}
  0x32   : > { %2551 = dma.hbm_to_vmem [thread:$0]  (!%p2944_p5), %s4154_s2, 1024, %s2950_s10, [#allocation5], %s2865_s13, %s2865_s13, %s2866_s14  }
  0x33   : > { %s2867_s30 = smov [#allocation9]   ;;  %s2868_s9 = smov [#allocation10]  }
  0x34   : > { %s235_s7 = sshll.u32 %s2867_s30, 4  ;;  %s248_s12 = sshll.u32 %s2868_s9, 4  ;;  %s236_s7 = int_to_ptr.vmem [resolvable:$true] %s235_s7  ;;  %s249_s12 = int_to_ptr.vmem [resolvable:$true] %s248_s12 }
  0x35   : > { %s2745_s15 = scalar_lea.vmem %s236_s7, 1024  ;;  %p2753_p11 = scmp.lt.s32.totalorder %s236_s7, %s236_s7 }
  0x36   : > { %p2746_p8 = scmp.ne.s32.totalorder %s236_s7, %s2745_s15  ;;  %p2754_p12 = scmp.lt.s32.totalorder %s2745_s15, %s2745_s15 }
  0x38   : > { %p2748_p9 = pnand %p2746_p8, %p2954_p6  ;;  %p2755_p13 = por %p2754_p12, %p2753_p11 }
  0x3a   : > { %p2749_p10 = pneg %p2748_p9 }
  0x3c   : > { %p2756_p0 = pnand %p2755_p13, %p2749_p10 }
  0x3e   : > { %2759 = shalt.err (!%p2756_p0)
}
  0x3f   : > { %2557 = dma.hbm_to_vmem [thread:$0]  (!%p2944_p5), %s4156_s4, 1024, %s236_s7, [#allocation8], %s2865_s13, %s2865_s13, %s2866_s14  }
  0x40   : > { %s2771_s17 = scalar_lea.vmem %s249_s12, 256  ;;  %p2779_p8 = scmp.lt.s32.totalorder %s249_s12, %s249_s12 }
  0x41   : > { %p2772_p2 = scmp.ne.s32.totalorder %s249_s12, %s2771_s17  ;;  %p2780_p9 = scmp.lt.s32.totalorder %s2771_s17, %s2771_s17 }
  0x43   : > { %p2774_p4 = pnand %p2772_p2, %p2954_p6  ;;  %p2781_p10 = por %p2780_p9, %p2779_p8 }
  0x45   : > { %p2775_p7 = pneg %p2774_p4 }
  0x47   : > { %p2782_p11 = pnand %p2781_p10, %p2775_p7 }
  0x49   : > { %2785 = shalt.err (!%p2782_p11)
}
  0x4a   : > { %s2869_s18 = smov 128   ;;  %s2870_s11 = smov 8  }
  0x4b   : > { %2560 = dma.hbm_to_vmem [thread:$0]  (!%p2944_p5), %s4157_s5, 256, %s249_s12, [#allocation11], %s2869_s18, %s2869_s18, %s2870_s11  }
  0x4c   : > { %s3019_s19 = sadd.s32 1, %s2860_s24   ;;  %s29_s25 = sadd.s32 1, %s2856_s23 }
  0x4d   : > { %s26_s20 = ssub.s32 %s2860_s24, %s3019_s19  ;;  %p36_p12 = scmp.ne.s32.totalorder %s2856_s23, %s2852_s22 }
  0x4e   : > { %p27_p6 = scmp.eq.s32.totalorder %s26_s20, 0  ;;  %p37_p13 = scmp.eq.s32.totalorder %s2860_s24, 0 }
  0x4f   : > { %p42_p0 = scmp.ne.s32.totalorder %s2852_s22, %s2848_s21  ;;  %p2570_p7 = scmp.lt.s32.totalorder %s2860_s24, 2 }
  0x50   : > { %s3030_s26 = scalar_select %p27_p6, %s2856_s23, %s29_s25  }
  0x51   : > { %p38_p2 = por %p37_p13, %p36_p12  ;;  %p3034_p4 = por %p2931_p1, %p42_p0 }
  0x52   : > { %s262_s30 = sand.u32 1, %s2856_s23   ;;  %s2234_s9 = sshll.u32 %s2860_s24, 12 }
  0x53   : > { %s4167_s8 = scalar_select %p3034_p4, 1, 0 }
  0x54   : > { %s2188_s7 = sshll.u32 %s262_s30, 8  ;;  %s3044_s10 = scalar_lea.hbm %s4152_s0, %s2234_s9 }
  0x55   : > { %s266_s21 = scalar_lea.vmem [#allocation2], %s2188_s7  ;;  %p3048_p5 = pnand %p2570_p7, %p38_p2 }
  0x56   : > { %s273_s16 = sshll.u32 %s266_s21, 4  ;;  %s3052_s13 = scalar_lea.sflag [#allocation3], %s262_s30  ;;  %s3046_s16 = int_to_ptr.vmem [resolvable:$true] %s273_s16 }
  0x57   : > { %s2786_s14 = scalar_lea.hbm %s3044_s10, 4096  ;;  %p2788_p9 = pneg %p3048_p5 }
  0x58   : > { %p2787_p8 = scmp.ne.s32.totalorder %s3044_s10, %s2786_s14  ;;  %s2791_s7 = scalar_lea.hbm %s4152_s0, 8192 }
  0x59   : > { %p2792_p6 = scmp.lt.s32.totalorder %s3044_s10, %s4152_s0  ;;  %p2793_p12 = scmp.lt.s32.totalorder %s2791_s7, %s2786_s14 }
  0x5a   : > { %p2789_p10 = pnand %p2788_p9, %p2787_p8 }
  0x5b   : > { %p2794_p13 = por %p2793_p12, %p2792_p6 }
  0x5c   : > { %p2790_p11 = pneg %p2789_p10 }
  0x5e   : > { %p2795_p0 = pnand %p2794_p13, %p2790_p11 }
  0x60   : > { %2798 = shalt.err (!%p2795_p0)
}
  0x61   : > { %s2799_s30 = scalar_lea.vmem %s3046_s16, 4096  ;;  %s2871_s15 = smov [#allocation2]  }
  0x62   : > { %p2800_p2 = scmp.ne.s32.totalorder %s3046_s16, %s2799_s30  ;;  %s2804_s21 = sshll.u32 %s2871_s15, 4  ;;  %s2805_s21 = int_to_ptr.vmem [resolvable:$false] %s2804_s21 }
  0x63   : > { %s2806_s20 = scalar_lea.vmem %s2805_s21, 8192  ;;  %p2807_p10 = scmp.lt.s32.totalorder %s3046_s16, %s2805_s21 }
  0x64   : > { %p2802_p7 = pnand %p2800_p2, %p2788_p9  ;;  %p2808_p1 = scmp.lt.s32.totalorder %s2806_s20, %s2799_s30 }
  0x66   : > { %p2803_p8 = pneg %p2802_p7  ;;  %p2809_p4 = por %p2808_p1, %p2807_p10 }
  0x68   : > { %p2810_p3 = pnand %p2809_p4, %p2803_p8 }
  0x6a   : > { %2813 = shalt.err (!%p2810_p3)
}
  0x6b   : > { %2564 = dma.hbm_to_vmem [thread:$0]  (!%p3048_p5), %s3044_s10, 4096, %s3046_s16, %s3052_s13, %s2869_s18, %s2869_s18, %s2870_s11  }
  0x6c   : > { %p4169_p9 = scmp.ne.s32.totalorder %s4164_s29, 0 }
  0x6d   : > { %s287_s14 = sand.u32 (!%p4169_p9), 1, %s2852_s22   ;;  %p4170_p1 = scmp.ne.s32.totalorder (!%p4169_p9), %s4167_s8, 0 }
  0x6e   : > { %285 = sbr.rel (%p4169_p9) target bundleno = 1362 (0x552), region = 44  ;;  %s2192_s25 = sshll.u32 (!%p4169_p9), %s287_s14, 8 }
  0x6f   : > { %s288_s7 = scalar_lea.sflag (!%p4169_p9), [#allocation3], %s287_s14  ;;  %s3079_s9 = scalar_lea.vmem (!%p4169_p9), [#allocation2], %s2192_s25 }
  0x73   : > { %2831 = dma.done.wait (%p4170_p1), %s288_s7, 4096  }
  0x74   : > { %2833 = vsyncadd (%p4170_p1), %s288_s7, 4294963200  ;;  %p4171_p3 = scmp.ne.s32.totalorder %s4163_s28, 0 }
  0x76   : > { %2835 = dma.done.wait (%p4171_p3), [#allocation5], 2048  }
  0x77   : > { %2837 = vsyncadd (%p4171_p3), [#allocation5], 4294965248 }
  0x78   : > { %2839 = dma.done.wait (%p4171_p3), [#allocation8], 2048  }
  0x79   : > { %2841 = vsyncadd (%p4171_p3), [#allocation8], 4294965248 }
  0x7a   : > { %2843 = dma.done.wait (%p4171_p3), [#allocation11], 256  }
  0x7b   : > { %2845 = vsyncadd (%p4171_p3), [#allocation11], 4294967040  ;;  %v2617_v0 = vld [vmem:[#allocation4 + $0x38] sm:$0xff]   ;;  %v2618_v1 = vld [vmem:[#allocation4 + $0x30] sm:$0xff]   ;;  %v414_v61 = vlaneseq  ;;  %s2198_s28 = sshll.u32 %s2179_s27, 5 }
  0x7c   : > { %2331 = vmatprep.subr.bf16.mxu0 %v2617_v0  ;;  %v2619_v2 = vld [vmem:[#allocation4 + $0x28] sm:$0xff]   ;;  %v2620_v3 = vld [vmem:[#allocation4 + $0x20] sm:$0xff]   ;;  %v2621_v7 = vld [vmem:[#allocation4 + $0x18] sm:$0xff]   ;;  %p342_p4 = scmp.lt.s32.totalorder %s2198_s28, 63 }
  0x7d   : > { %2332 = vmatpush3.bf16.msra.mxu0 %v2617_v0  ;;  %v350_v4 = vld [vmem:[%s3079_s9] sm:$0xff]  ;;  %v351_v5 = vld [vmem:[%s3079_s9 + $0x8] sm:$0xff]  ;;  %v2622_v8 = vld [vmem:[#allocation4 + $0x10] sm:$0xff]   ;;  %v3129_v63 = vshrl.u32 %v414_v61, 7 }
  0x7e   : > { %2333 = vmatprep.subr.bf16.mxu0 %v2618_v1  ;;  %v382_v6 = vpack.c.bf16 %v351_v5, %v350_v4  ;;  %v2623_v9 = vld [vmem:[#allocation4 + $0x8] sm:$0xff]   ;;  %v2624_v10 = vld [vmem:[#allocation4] sm:$0xff]   ;;  %v352_v11 = vld [vmem:[%s3079_s9 + $0x10] sm:$0xff]  ;;  %s4177_s28 = smov (!%p342_p4, %s2198_s28), 63 }
  0x7f   : > { %v353_v12 = vld [vmem:[%s3079_s9 + $0x18] sm:$0xff]  ;;  %v354_v13 = vld [vmem:[%s3079_s9 + $0x20] sm:$0xff]  ;;  %v355_v14 = vld [vmem:[%s3079_s9 + $0x28] sm:$0xff]  ;;  %s2199_s29 = sshll.u32 %s4177_s28, 3 }
  0x80   : > { %2347 = vmatprep.mubr.bf16.mxu0 %v382_v6  ;;  %v383_v15 = vpack.c.bf16 %v353_v12, %v352_v11  ;;  %v384_v16 = vpack.c.bf16 %v355_v14, %v354_v13  ;;  %v356_v17 = vld [vmem:[%s3079_s9 + $0x30] sm:$0xff]  ;;  %v357_v18 = vld [vmem:[%s3079_s9 + $0x38] sm:$0xff]  ;;  %v358_v19 = vld [vmem:[%s3079_s9 + $0x40] sm:$0xff]  ;;  %s4073_s8 = scalar_lea.vmem %s4158_s6, %s2199_s29 }
  0x81   : > { %2334 = vmatpush3.bf16.msra.mxu0 %v2618_v1  ;;  %v359_v20 = vld [vmem:[%s3079_s9 + $0x48] sm:$0xff]  ;;  %v385_v21 = vpack.c.bf16 %v357_v18, %v356_v17  ;;  %v360_v23 = vld [vmem:[%s3079_s9 + $0x50] sm:$0xff]  ;;  %v361_v24 = vld [vmem:[%s3079_s9 + $0x58] sm:$0xff] }
  0x82   : > { %2335 = vmatprep.subr.bf16.mxu0 %v2619_v2  ;;  %v386_v22 = vpack.c.bf16 %v359_v20, %v358_v19  ;;  %v362_v25 = vld [vmem:[%s3079_s9 + $0x60] sm:$0xff]  ;;  %v363_v26 = vld [vmem:[%s3079_s9 + $0x68] sm:$0xff]  ;;  %v387_v27 = vpack.c.bf16 %v361_v24, %v360_v23  ;;  %v364_v29 = vld [vmem:[%s3079_s9 + $0x70] sm:$0xff] }
  0x83   : > { %v388_v28 = vpack.c.bf16 %v363_v26, %v362_v25  ;;  %v365_v30 = vld [vmem:[%s3079_s9 + $0x78] sm:$0xff]  ;;  %v366_v31 = vld [vmem:[%s3079_s9 + $0x80] sm:$0xff]  ;;  %v367_v32 = vld [vmem:[%s3079_s9 + $0x88] sm:$0xff] }
  0x84   : > { %v389_v33 = vpack.c.bf16 %v365_v30, %v364_v29  ;;  %v390_v34 = vpack.c.bf16 %v367_v32, %v366_v31  ;;  %v368_v35 = vld [vmem:[%s3079_s9 + $0x90] sm:$0xff]  ;;  %v369_v36 = vld [vmem:[%s3079_s9 + $0x98] sm:$0xff]  ;;  %v370_v37 = vld [vmem:[%s3079_s9 + $0xa0] sm:$0xff] }
  0x85   : > { %2336 = vmatpush3.bf16.msra.mxu0 %v2619_v2  ;;  %v371_v38 = vld [vmem:[%s3079_s9 + $0xa8] sm:$0xff]  ;;  %v391_v39 = vpack.c.bf16 %v369_v36, %v368_v35  ;;  %v372_v41 = vld [vmem:[%s3079_s9 + $0xb0] sm:$0xff]  ;;  %v373_v42 = vld [vmem:[%s3079_s9 + $0xb8] sm:$0xff]  ;;  %v416_v2 = vsub.s32 0, %v3129_v63 }
  0x86   : > { %2337 = vmatprep.subr.bf16.mxu0 %v2620_v3  ;;  %v392_v40 = vpack.c.bf16 %v371_v38, %v370_v37  ;;  %v374_v43 = vld [vmem:[%s3079_s9 + $0xc0] sm:$0xff]  ;;  %v375_v44 = vld [vmem:[%s3079_s9 + $0xc8] sm:$0xff]  ;;  %v393_v45 = vpack.c.bf16 %v373_v42, %v372_v41  ;;  %v376_v47 = vld [vmem:[%s3079_s9 + $0xd0] sm:$0xff] }
  0x87   : > { %v394_v46 = vpack.c.bf16 %v375_v44, %v374_v43  ;;  %v377_v48 = vld [vmem:[%s3079_s9 + $0xd8] sm:$0xff]  ;;  %v378_v49 = vld [vmem:[%s3079_s9 + $0xe0] sm:$0xff]  ;;  %v379_v50 = vld [vmem:[%s3079_s9 + $0xe8] sm:$0xff] }
  0x88   : > { %v395_v51 = vpack.c.bf16 %v377_v48, %v376_v47  ;;  %v396_v52 = vpack.c.bf16 %v379_v50, %v378_v49  ;;  %v380_v53 = vld [vmem:[%s3079_s9 + $0xf0] sm:$0xff]  ;;  %v381_v54 = vld [vmem:[%s3079_s9 + $0xf8] sm:$0xff]  ;;  %v2627_v58 = vld [vmem:[#allocation6 + $0x28] sm:$0xff]  }
  0x89   : > { %2338 = vmatpush3.bf16.msra.mxu0 %v2620_v3  ;;  %v397_v55 = vpack.c.bf16 %v381_v54, %v380_v53  ;;  %v2625_v56 = vld [vmem:[#allocation6 + $0x38] sm:$0xff]   ;;  %v2626_v57 = vld [vmem:[#allocation6 + $0x30] sm:$0xff]   ;;  %v2628_v59 = vld [vmem:[#allocation6 + $0x20] sm:$0xff]  }
  0x8a   : > { %2339 = vmatprep.subr.bf16.mxu0 %v2621_v7  ;;  %2379 = vmatprep.subr.bf16.mxu1 %v2625_v56  ;;  %v2629_v60 = vld [vmem:[#allocation6 + $0x18] sm:$0xff]   ;;  %v2630_v62 = vld [vmem:[#allocation6 + $0x10] sm:$0xff]   ;;  %v2631_v0 = vld [vmem:[#allocation6 + $0x8] sm:$0xff]  }
  0x8b   : > { %2380 = vmatpush3.bf16.msra.mxu1 %v2625_v56  ;;  %v2632_v1 = vld [vmem:[#allocation6] sm:$0xff]  }
  0x8c   : > { %2381 = vmatprep.subr.bf16.mxu1 %v2626_v57  ;;  %v3132_v3 = vld [vmem:[#allocation10] sm:$0xff] }
  0x8d   : > { %2340 = vmatpush3.bf16.msra.mxu0 %v2621_v7  ;;  %v3137_v5 = vrot.slane %v3132_v3, %v416_v2 }
  0x8e   : > { %2341 = vmatprep.subr.bf16.mxu0 %v2622_v8 }
  0x8f   : > { %2382 = vmatpush3.bf16.msra.mxu1 %v2626_v57 }
  0x90   : > { %2383 = vmatprep.subr.bf16.mxu1 %v2627_v58 }
  0x91   : > { %2342 = vmatpush3.bf16.msra.mxu0 %v2622_v8 }
  0x92   : > { %2343 = vmatprep.subr.bf16.mxu0 %v2623_v9 }
  0x93   : > { %2384 = vmatpush3.bf16.msra.mxu1 %v2627_v58 }
  0x94   : > { %2385 = vmatprep.subr.bf16.mxu1 %v2628_v59 }
  0x95   : > { %2344 = vmatpush3.bf16.msra.mxu0 %v2623_v9 }
  0x96   : > { %2345 = vmatprep.subr.bf16.mxu0 %v2624_v10 }
  0x97   : > { %2386 = vmatpush3.bf16.msra.mxu1 %v2628_v59 }
  0x98   : > { %2387 = vmatprep.subr.bf16.mxu1 %v2629_v60 }
  0x99   : > { %2346 = vmatpush3.bf16.msra.mxu0 %v2624_v10 }
  0x9b   : > { %2388 = vmatpush3.bf16.msra.mxu1 %v2629_v60 }
  0x9c   : > { %2348 = vmatmul.mubr.bf16.vlgmr.msra.gmra.mxu0 %v383_v15  ;;  %2389 = vmatprep.subr.bf16.mxu1 %v2630_v62 }
  0x9d   : > { %2351 = vmatprep.mubr.bf16.mxu0 %v384_v16 }
  0x9f   : > { %2390 = vmatpush3.bf16.msra.mxu1 %v2630_v62 }
  0xa0   : > { %2391 = vmatprep.subr.bf16.mxu1 %v2631_v0 }
  0xa3   : > { %2392 = vmatpush3.bf16.msra.mxu1 %v2631_v0 }
  0xa4   : > { %2352 = vmatmul.mubr.bf16.gmra.mxu0 %v385_v21  ;;  %2393 = vmatprep.subr.bf16.mxu1 %v2632_v1 }
  0xa5   : > { %2355 = vmatprep.mubr.bf16.mxu0 %v386_v22 }
  0xa7   : > { %2394 = vmatpush3.bf16.msra.mxu1 %v2632_v1 }
  0xac   : > { %2356 = vmatmul.mubr.bf16.gmra.mxu0 %v387_v27 }
  0xad   : > { %2359 = vmatprep.mubr.bf16.mxu0 %v388_v28 }
  0xb4   : > { %2360 = vmatmul.mubr.bf16.gmra.mxu0 %v389_v33 }
  0xb5   : > { %2363 = vmatprep.mubr.bf16.mxu0 %v390_v34 }
  0xbc   : > { %2364 = vmatmul.mubr.bf16.gmra.mxu0 %v391_v39 }
  0xbd   : > { %2367 = vmatprep.mubr.bf16.mxu0 %v392_v40 }
  0xc4   : > { %2368 = vmatmul.mubr.bf16.gmra.mxu0 %v393_v45 }
  0xc5   : > { %2371 = vmatprep.mubr.bf16.mxu0 %v394_v46 }
  0xcc   : > { %2372 = vmatmul.mubr.bf16.gmra.mxu0 %v395_v51 }
  0xcd   : > { %2375 = vmatprep.mubr.bf16.mxu0 %v396_v52 }
  0xd4   : > { %2376 = vmatmul.mubr.bf16.gmra.mxu0 %v397_v55 }
 0x15c   : > { %v2349_v4 = vpop.f32.mrf.mxu0 }
 0x15d   : > { %v509_v9 = vadd.f32 %v2349_v4, %v3137_v5 }
 0x15e   : > { %v500_v6 = vpop.f32.mrf.mxu0 }
 0x15f   : > { %v501_v7 = vadd.f32 %v500_v6, %v3137_v5  ;;  %v3145_v15 = vmax.f32 %v509_v9, 0.0 }
 0x160   : > { %v2350_v8 = vpop.f32.mrf.mxu0 }
 0x161   : > { %v512_v10 = vadd.f32 %v2350_v8, %v3137_v5  ;;  %v3142_v12 = vmax.f32 %v501_v7, 0.0  ;;  %v700_v25 = vmul.f32 %v3145_v15, %v3145_v15 }
 0x162   : > { %v503_v11 = vpop.f32.mrf.mxu0 }
 0x163   : > { %v504_v13 = vadd.f32 %v503_v11, %v3137_v5  ;;  %v3149_v17 = vmax.f32 %v512_v10, 0.0  ;;  %v698_v19 = vmul.f32 %v3142_v12, %v3142_v12 }
 0x164   : > { %v2353_v14 = vpop.f32.mrf.mxu0 }
 0x165   : > { %v3147_v16 = vmax.f32 %v504_v13, 0.0  ;;  %v525_v23 = vadd.f32 %v2353_v14, %v3137_v5  ;;  %v701_v29 = vmul.f32 %v3149_v17, %v3149_v17 }
 0x166   : > { %v516_v18 = vpop.f32.mrf.mxu0 }
 0x167   : > { %v659_v20 = vadd.f32 %v3147_v16, %v3142_v12  ;;  %v699_v21 = vmul.f32 %v3147_v16, %v3147_v16  ;;  %v517_v22 = vadd.f32 %v516_v18, %v3137_v5  ;;  %v3169_v35 = vmax.f32 %v525_v23, 0.0 }
 0x168   : > { %v2354_v24 = vpop.f32.mrf.mxu0 }
 0x169   : > { %v660_v26 = vadd.f32 %v659_v20, %v3145_v15  ;;  %v730_v27 = vadd.f32 %v699_v21, %v698_v19  ;;  %v3162_v28 = vmax.f32 %v517_v22, 0.0  ;;  %v528_v33 = vadd.f32 %v2354_v24, %v3137_v5 }
 0x16a   : > { %v519_v30 = vpop.f32.mrf.mxu0  ;;  %v704_v49 = vmul.f32 %v3169_v35, %v3169_v35 }
 0x16b   : > { %v731_v31 = vadd.f32 %v730_v27, %v700_v25  ;;  %v661_v32 = vadd.f32 %v660_v26, %v3149_v17  ;;  %v520_v34 = vadd.f32 %v519_v30, %v3137_v5  ;;  %v702_v38 = vmul.f32 %v3162_v28, %v3162_v28 }
 0x16c   : > { %v2357_v36 = vpop.f32.mrf.mxu0  ;;  %v3176_v43 = vmax.f32 %v528_v33, 0.0 }
 0x16d   : > { %v662_v37 = vadd.f32 %v661_v32, %v3162_v28  ;;  %v732_v39 = vadd.f32 %v731_v31, %v701_v29  ;;  %v3174_v40 = vmax.f32 %v520_v34, 0.0  ;;  %v541_v46 = vadd.f32 %v2357_v36, %v3137_v5 }
 0x16e   : > { %v532_v41 = vpop.f32.mrf.mxu0  ;;  %v705_v55 = vmul.f32 %v3176_v43, %v3176_v43 }
 0x16f   : > { %v733_v42 = vadd.f32 %v732_v39, %v702_v38  ;;  %v663_v44 = vadd.f32 %v662_v37, %v3174_v40  ;;  %v703_v45 = vmul.f32 %v3174_v40, %v3174_v40  ;;  %v533_v47 = vadd.f32 %v532_v41, %v3137_v5 }
 0x170   : > { %v2358_v48 = vpop.f32.mrf.mxu0  ;;  %v3193_v59 = vmax.f32 %v541_v46, 0.0 }
 0x171   : > { %v664_v50 = vadd.f32 %v663_v44, %v3169_v35  ;;  %v734_v51 = vadd.f32 %v733_v42, %v703_v45  ;;  %v3186_v52 = vmax.f32 %v533_v47, 0.0  ;;  %v544_v53 = vadd.f32 %v2358_v48, %v3137_v5 }
 0x172   : > { %v535_v54 = vpop.f32.mrf.mxu0  ;;  %v708_v13 = vmul.f32 %v3193_v59, %v3193_v59 }
 0x173   : > { %v735_v56 = vadd.f32 %v734_v51, %v704_v49  ;;  %v665_v57 = vadd.f32 %v664_v50, %v3176_v43  ;;  %v536_v58 = vadd.f32 %v535_v54, %v3137_v5  ;;  %v706_v62 = vmul.f32 %v3186_v52, %v3186_v52 }
 0x174   : > { %v2361_v60 = vpop.f32.mrf.mxu0  ;;  %v3200_v4 = vmax.f32 %v544_v53, 0.0 }
 0x175   : > { %v666_v61 = vadd.f32 %v665_v57, %v3186_v52  ;;  %v736_v0 = vadd.f32 %v735_v56, %v705_v55  ;;  %v3198_v1 = vmax.f32 %v536_v58, 0.0  ;;  %v557_v20 = vadd.f32 %v2361_v60, %v3137_v5 }
 0x176   : > { %v548_v6 = vpop.f32.mrf.mxu0  ;;  %v709_v22 = vmul.f32 %v3200_v4, %v3200_v4 }
 0x177   : > { %v737_v7 = vadd.f32 %v736_v0, %v706_v62  ;;  %v667_v8 = vadd.f32 %v666_v61, %v3198_v1  ;;  %v707_v9 = vmul.f32 %v3198_v1, %v3198_v1  ;;  %v549_v10 = vadd.f32 %v548_v6, %v3137_v5 }
 0x178   : > { %v2362_v11 = vpop.f32.mrf.mxu0  ;;  %v3220_v32 = vmax.f32 %v557_v20, 0.0 }
 0x179   : > { %v668_v14 = vadd.f32 %v667_v8, %v3193_v59  ;;  %v738_v18 = vadd.f32 %v737_v7, %v707_v9  ;;  %v3209_v19 = vmax.f32 %v549_v10, 0.0  ;;  %v560_v25 = vadd.f32 %v2362_v11, %v3137_v5 }
 0x17a   : > { %v551_v21 = vpop.f32.mrf.mxu0  ;;  %v712_v45 = vmul.f32 %v3220_v32, %v3220_v32 }
 0x17b   : > { %v739_v23 = vadd.f32 %v738_v18, %v708_v13  ;;  %v669_v24 = vadd.f32 %v668_v14, %v3200_v4  ;;  %v552_v26 = vadd.f32 %v551_v21, %v3137_v5  ;;  %v710_v30 = vmul.f32 %v3209_v19, %v3209_v19 }
 0x17c   : > { %v2365_v27 = vpop.f32.mrf.mxu0  ;;  %v3225_v38 = vmax.f32 %v560_v25, 0.0 }
 0x17d   : > { %v670_v29 = vadd.f32 %v669_v24, %v3209_v19  ;;  %v740_v31 = vadd.f32 %v739_v23, %v709_v22  ;;  %v3222_v33 = vmax.f32 %v552_v26, 0.0  ;;  %v573_v44 = vadd.f32 %v2365_v27, %v3137_v5 }
 0x17e   : > { %v564_v34 = vpop.f32.mrf.mxu0  ;;  %v713_v51 = vmul.f32 %v3225_v38, %v3225_v38 }
 0x17f   : > { %v741_v36 = vadd.f32 %v740_v31, %v710_v30  ;;  %v565_v37 = vadd.f32 %v564_v34, %v3137_v5  ;;  %v671_v39 = vadd.f32 %v670_v29, %v3222_v33  ;;  %v711_v41 = vmul.f32 %v3222_v33, %v3222_v33 }
 0x180   : > { %v2366_v42 = vpop.f32.mrf.mxu0  ;;  %v3241_v57 = vmax.f32 %v573_v44, 0.0 }
 0x181   : > { %v672_v46 = vadd.f32 %v671_v39, %v3220_v32  ;;  %v742_v47 = vadd.f32 %v741_v36, %v711_v41  ;;  %v3234_v48 = vmax.f32 %v565_v37, 0.0  ;;  %v576_v55 = vadd.f32 %v2366_v42, %v3137_v5 }
 0x182   : > { %v567_v49 = vpop.f32.mrf.mxu0  ;;  %v716_v13 = vmul.f32 %v3241_v57, %v3241_v57 }
 0x183   : > { %v568_v50 = vadd.f32 %v567_v49, %v3137_v5  ;;  %v743_v53 = vadd.f32 %v742_v47, %v712_v45  ;;  %v673_v54 = vadd.f32 %v672_v46, %v3225_v38  ;;  %v714_v61 = vmul.f32 %v3234_v48, %v3234_v48 }
 0x184   : > { %v2369_v56 = vpop.f32.mrf.mxu0  ;;  %v3251_v9 = vmax.f32 %v576_v55, 0.0 }
 0x185   : > { %v3243_v58 = vmax.f32 %v568_v50, 0.0  ;;  %v674_v60 = vadd.f32 %v673_v54, %v3234_v48  ;;  %v744_v62 = vadd.f32 %v743_v53, %v713_v51  ;;  %v589_v20 = vadd.f32 %v2369_v56, %v3137_v5 }
 0x186   : > { %v580_v0 = vpop.f32.mrf.mxu0  ;;  %v717_v24 = vmul.f32 %v3251_v9, %v3251_v9 }
 0x187   : > { %v715_v6 = vmul.f32 %v3243_v58, %v3243_v58  ;;  %v581_v7 = vadd.f32 %v580_v0, %v3137_v5  ;;  %v745_v8 = vadd.f32 %v744_v62, %v714_v61  ;;  %v675_v10 = vadd.f32 %v674_v60, %v3243_v58 }
 0x188   : > { %v2370_v11 = vpop.f32.mrf.mxu0  ;;  %v3267_v31 = vmax.f32 %v589_v20, 0.0 }
 0x189   : > { %v676_v14 = vadd.f32 %v675_v10, %v3241_v57  ;;  %v746_v18 = vadd.f32 %v745_v8, %v715_v6  ;;  %v3258_v21 = vmax.f32 %v581_v7, 0.0  ;;  %v592_v27 = vadd.f32 %v2370_v11, %v3137_v5 }
 0x18a   : > { %v583_v22 = vpop.f32.mrf.mxu0  ;;  %v720_v50 = vmul.f32 %v3267_v31, %v3267_v31 }
 0x18b   : > { %v584_v23 = vadd.f32 %v583_v22, %v3137_v5  ;;  %v747_v25 = vadd.f32 %v746_v18, %v716_v13  ;;  %v677_v26 = vadd.f32 %v676_v14, %v3251_v9  ;;  %v718_v36 = vmul.f32 %v3258_v21, %v3258_v21 }
 0x18c   : > { %v2373_v29 = vpop.f32.mrf.mxu0  ;;  %v3275_v45 = vmax.f32 %v592_v27, 0.0 }
 0x18d   : > { %v3265_v30 = vmax.f32 %v584_v23, 0.0  ;;  %v678_v34 = vadd.f32 %v677_v26, %v3258_v21  ;;  %v748_v37 = vadd.f32 %v747_v25, %v717_v24  ;;  %v605_v49 = vadd.f32 %v2373_v29, %v3137_v5 }
 0x18e   : > { %v596_v39 = vpop.f32.mrf.mxu0  ;;  %v721_v60 = vmul.f32 %v3275_v45, %v3275_v45 }
 0x18f   : > { %v719_v41 = vmul.f32 %v3265_v30, %v3265_v30  ;;  %v597_v42 = vadd.f32 %v596_v39, %v3137_v5  ;;  %v749_v44 = vadd.f32 %v748_v37, %v718_v36  ;;  %v679_v46 = vadd.f32 %v678_v34, %v3265_v30 }
 0x190   : > { %v2374_v47 = vpop.f32.mrf.mxu0  ;;  %v3289_v7 = vmax.f32 %v605_v49, 0.0 }
 0x191   : > { %v680_v51 = vadd.f32 %v679_v46, %v3267_v31  ;;  %v750_v53 = vadd.f32 %v749_v44, %v719_v41  ;;  %v3282_v54 = vmax.f32 %v597_v42, 0.0  ;;  %v608_v0 = vadd.f32 %v2374_v47, %v3137_v5 }
 0x192   : > { %v599_v55 = vpop.f32.mrf.mxu0  ;;  %v724_v26 = vmul.f32 %v3289_v7, %v3289_v7 }
 0x193   : > { %v600_v56 = vadd.f32 %v599_v55, %v3137_v5  ;;  %v751_v61 = vadd.f32 %v750_v53, %v720_v50  ;;  %v681_v62 = vadd.f32 %v680_v51, %v3275_v45  ;;  %v722_v11 = vmul.f32 %v3282_v54, %v3282_v54 }
 0x194   : > { %v2377_v6 = vpop.f32.mrf.mxu0  ;;  %v3299_v23 = vmax.f32 %v608_v0, 0.0 }
 0x195   : > { %v3291_v8 = vmax.f32 %v600_v56, 0.0  ;;  %v682_v10 = vadd.f32 %v681_v62, %v3282_v54  ;;  %v752_v13 = vadd.f32 %v751_v61, %v721_v60  ;;  %v621_v34 = vadd.f32 %v2377_v6, %v3137_v5 }
 0x196   : > { %v612_v14 = vpop.f32.mrf.mxu0  ;;  %v725_v41 = vmul.f32 %v3299_v23, %v3299_v23 }
 0x197   : > { %v723_v18 = vmul.f32 %v3291_v8, %v3291_v8  ;;  %v613_v20 = vadd.f32 %v612_v14, %v3137_v5  ;;  %v753_v22 = vadd.f32 %v752_v13, %v722_v11  ;;  %v683_v24 = vadd.f32 %v682_v10, %v3291_v8 }
 0x198   : > { %v2378_v25 = vpop.f32.mrf.mxu0  ;;  %v3315_v49 = vmax.f32 %v621_v34, 0.0 }
 0x199   : > { %v684_v27 = vadd.f32 %v683_v24, %v3289_v7  ;;  %v754_v29 = vadd.f32 %v753_v22, %v723_v18  ;;  %v3306_v36 = vmax.f32 %v613_v20, 0.0  ;;  %v624_v46 = vadd.f32 %v2378_v25, %v3137_v5 }
 0x19a   : > { %v615_v37 = vpop.f32.mrf.mxu0 }
 0x19b   : > { %v616_v39 = vadd.f32 %v615_v37, %v3137_v5  ;;  %v755_v42 = vadd.f32 %v754_v29, %v724_v26  ;;  %v685_v44 = vadd.f32 %v684_v27, %v3299_v23  ;;  %v726_v51 = vmul.f32 %v3306_v36, %v3306_v36 }
 0x19c   : > { %v658_v60 = vmax.f32 %v624_v46, 0.0  ;;  %v728_v5 = vmul.f32 %v3315_v49, %v3315_v49 }
 0x19d   : > { %v3313_v47 = vmax.f32 %v616_v39, 0.0  ;;  %v686_v50 = vadd.f32 %v685_v44, %v3306_v36  ;;  %v756_v53 = vadd.f32 %v755_v42, %v725_v41 }
 0x19e   : > { %v729_v6 = vmul.f32 %v658_v60, %v658_v60 }
 0x19f   : > { %v727_v55 = vmul.f32 %v3313_v47, %v3313_v47  ;;  %v757_v56 = vadd.f32 %v756_v53, %v726_v51  ;;  %v687_v61 = vadd.f32 %v686_v50, %v3313_v47 }
 0x1a1   : > { %v688_v62 = vadd.f32 %v687_v61, %v3315_v49  ;;  %v758_v0 = vadd.f32 %v757_v56, %v727_v55  ;;  %v781_v61 = vsub.s32 1, %v3129_v63 }
 0x1a3   : > { %v689_v10 = vadd.f32 %v688_v62, %v658_v60  ;;  %v759_v11 = vadd.f32 %v758_v0, %v728_v5  ;;  %v817_v62 = vsub.s32 2, %v3129_v63 }
 0x1a5   : > { %v690_v13 = vrot.slane %v689_v10, 4  ;;  %v760_v14 = vadd.f32 %v759_v11, %v729_v6 }
 0x1a7   : > { %v691_v18 = vadd.f32 %v690_v13, %v689_v10  ;;  %v761_v20 = vrot.slane %v760_v14, 4 }
 0x1a9   : > { %v692_v22 = vrot.slane %v691_v18, 2  ;;  %v762_v24 = vadd.f32 %v761_v20, %v760_v14 }
 0x1ab   : > { %v693_v25 = vadd.f32 %v692_v22, %v691_v18  ;;  %v763_v26 = vrot.slane %v762_v24, 2 }
 0x1ad   : > { %v694_v27 = vrot.slane %v693_v25, 1  ;;  %v764_v29 = vadd.f32 %v763_v26, %v762_v24 }
 0x1af   : > { %v695_v34 = vadd.f32 %v694_v27, %v693_v25  ;;  %v765_v37 = vrot.slane %v764_v29, 1 }
 0x1b1   : > { %v697_v39 = vmul.f32 0.00390625, %v695_v34  ;;  %v766_v41 = vadd.f32 %v765_v37, %v764_v29 }
 0x1b3   : > { %v767_v42 = vmul.f32 0.00390625, %v766_v41  ;;  %v768_v44 = vmul.f32 %v697_v39, %v697_v39 }
 0x1b5   : > { %v769_v46 = vsub.f32 %v767_v42, %v768_v44 }
 0x1b7   : > { %v770_v50 = vmax.f32 %v769_v46, 0.0 }
 0x1b9   : > { %v771_v51 = vadd.f32 1e-05, %v770_v50 }
 0x1bb   : > { %2649 = vrsqrt.f32 %v771_v51 }
 0x1c8   : > { %v2650_v53 = vpop.eup %2649 }
 0x1c9   : > { %v773_v55 = vmul.f32 %v2650_v53, %v3132_v3 }
 0x1cb   : > { %v774_v56 = vmul.f32 %v773_v55, %v697_v39  ;;  %v3332_v6 = vrot.slane %v773_v55, %v781_v61 }
 0x1cd   : > { %v776_v5 = vrot.slane %v774_v56, 7  ;;  %v785_v11 = vmul.f32 %v3332_v6, %v3145_v15  ;;  %v786_v13 = vmul.f32 %v3332_v6, %v3149_v17  ;;  %v787_v14 = vmul.f32 %v3332_v6, %v3162_v28 }
 0x1ce   : > { %v788_v18 = vmul.f32 %v3332_v6, %v3174_v40  ;;  %v783_v20 = vmul.f32 %v3332_v6, %v3142_v12  ;;  %v784_v22 = vmul.f32 %v3332_v6, %v3147_v16  ;;  %v789_v12 = vmul.f32 %v3332_v6, %v3169_v35 }
 0x1cf   : > { %v778_v0 = vsub.f32 %v3132_v3, %v776_v5  ;;  %v790_v16 = vmul.f32 %v3332_v6, %v3176_v43  ;;  %v812_v34 = vmul.f32 %v3332_v6, %v3313_v47  ;;  %v791_v37 = vmul.f32 %v3332_v6, %v3186_v52 }
 0x1d0   : > { %v792_v39 = vmul.f32 %v3332_v6, %v3198_v1  ;;  %v811_v41 = vmul.f32 %v3332_v6, %v3306_v36  ;;  %v813_v35 = vmul.f32 %v3332_v6, %v3315_v49  ;;  %v814_v42 = vmul.f32 %v3332_v6, %v658_v60 }
 0x1d1   : > { %v3334_v10 = vrot.slane %v778_v0, %v817_v62  ;;  %v793_v55 = vmul.f32 %v3332_v6, %v3193_v59  ;;  %v794_v56 = vmul.f32 %v3332_v6, %v3200_v4  ;;  %v795_v5 = vmul.f32 %v3332_v6, %v3209_v19 }
 0x1d2   : > { %v796_v62 = vmul.f32 %v3332_v6, %v3222_v33  ;;  %v797_v4 = vmul.f32 %v3332_v6, %v3220_v32  ;;  %v798_v19 = vmul.f32 %v3332_v6, %v3225_v38  ;;  %v799_v33 = vmul.f32 %v3332_v6, %v3234_v48 }
 0x1d3   : > { %v821_v24 = vadd.f32 %v3334_v10, %v785_v11  ;;  %v822_v25 = vadd.f32 %v3334_v10, %v786_v13  ;;  %v819_v15 = vadd.f32 %v3334_v10, %v783_v20  ;;  %v820_v17 = vadd.f32 %v3334_v10, %v784_v22 }
 0x1d4   : > { %v823_v26 = vadd.f32 %v3334_v10, %v787_v14  ;;  %v824_v28 = vadd.f32 %v3334_v10, %v788_v18  ;;  %v825_v43 = vadd.f32 %v3334_v10, %v789_v12  ;;  %v826_v44 = vadd.f32 %v3334_v10, %v790_v16 }
 0x1d5   : > { %v852_v27 = vpack.c.bf16 %v822_v25, %v821_v24  ;;  %v851_v40 = vpack.c.bf16 %v820_v17, %v819_v15  ;;  %v827_v47 = vadd.f32 %v3334_v10, %v791_v37  ;;  %v828_v52 = vadd.f32 %v3334_v10, %v792_v39 }
 0x1d6   : > { %v853_v29 = vpack.c.bf16 %v824_v28, %v823_v26  ;;  %v3374_v46 = vadd.f32 %v3334_v10, %v811_v41  ;;  %v3377_v1 = vadd.f32 %v3334_v10, %v812_v34  ;;  %v3380_v36 = vadd.f32 %v3334_v10, %v813_v35 }
 0x1d7   : > { %2395 = vmatprep.mubr.bf16.mxu1 %v851_v40  ;;  %v850_v49 = vadd.f32 %v3334_v10, %v814_v42  ;;  %v854_v60 = vpack.c.bf16 %v826_v44, %v825_v43  ;;  %v855_v53 = vpack.c.bf16 %v828_v52, %v827_v47  ;;  %v829_v0 = vadd.f32 %v3334_v10, %v793_v55  ;;  %v2633_v44 = vld [vmem:[#allocation7 + $0x38] sm:$0xff]   ;;  %v2634_v47 = vld [vmem:[#allocation7 + $0x30] sm:$0xff]   ;;  %v2639_v52 = vld [vmem:[#allocation7 + $0x8] sm:$0xff]  }
 0x1d8   : > { %2396 = vmatmul.mubr.bf16.vlgmr.msra.gmra.mxu1 %v852_v27  ;;  %v865_v50 = vpack.c.bf16 %v3377_v1, %v3374_v46  ;;  %v830_v11 = vadd.f32 %v3334_v10, %v794_v56  ;;  %v831_v13 = vadd.f32 %v3334_v10, %v795_v5  ;;  %v832_v14 = vadd.f32 %v3334_v10, %v796_v62  ;;  %v2640_v1 = vld [vmem:[#allocation7] sm:$0xff]  }
 0x1d9   : > { %2399 = vmatprep.mubr.bf16.mxu1 %v853_v29  ;;  %v866_v51 = vpack.c.bf16 %v850_v49, %v3380_v36  ;;  %v800_v20 = vmul.f32 %v3332_v6, %v3243_v58  ;;  %v833_v22 = vadd.f32 %v3334_v10, %v797_v4  ;;  %v834_v24 = vadd.f32 %v3334_v10, %v798_v19 }
 0x1da   : > { %v856_v59 = vpack.c.bf16 %v830_v11, %v829_v0  ;;  %v857_v18 = vpack.c.bf16 %v832_v14, %v831_v13  ;;  %v835_v25 = vadd.f32 %v3334_v10, %v799_v33  ;;  %v801_v38 = vmul.f32 %v3332_v6, %v3241_v57  ;;  %2427 = vmatprep.subr.bf16.mxu0 %v2633_v44 }
 0x1db   : > { %v836_v15 = vadd.f32 %v3334_v10, %v800_v20  ;;  %v858_v32 = vpack.c.bf16 %v834_v24, %v833_v22  ;;  %v802_v48 = vmul.f32 %v3332_v6, %v3251_v9  ;;  %v803_v58 = vmul.f32 %v3332_v6, %v3258_v21  ;;  %2428 = vmatpush3.bf16.msra.mxu0 %v2633_v44 }
 0x1dc   : > { %v804_v26 = vmul.f32 %v3332_v6, %v3265_v30  ;;  %v837_v28 = vadd.f32 %v3334_v10, %v801_v38  ;;  %v805_v9 = vmul.f32 %v3332_v6, %v3267_v31  ;;  %v806_v21 = vmul.f32 %v3332_v6, %v3275_v45  ;;  %2429 = vmatprep.subr.bf16.mxu0 %v2634_v47 }
 0x1dd   : > { %v859_v17 = vpack.c.bf16 %v836_v15, %v835_v25  ;;  %v838_v27 = vadd.f32 %v3334_v10, %v802_v48  ;;  %v839_v40 = vadd.f32 %v3334_v10, %v803_v58  ;;  %v807_v30 = vmul.f32 %v3332_v6, %v3282_v54 }
 0x1de   : > { %v840_v29 = vadd.f32 %v3334_v10, %v804_v26  ;;  %v808_v16 = vmul.f32 %v3332_v6, %v3291_v8  ;;  %v841_v34 = vadd.f32 %v3334_v10, %v805_v9  ;;  %v842_v37 = vadd.f32 %v3334_v10, %v806_v21 }
 0x1df   : > { %v860_v57 = vpack.c.bf16 %v838_v27, %v837_v28  ;;  %v843_v39 = vadd.f32 %v3334_v10, %v807_v30  ;;  %v809_v45 = vmul.f32 %v3332_v6, %v3289_v7  ;;  %v810_v54 = vmul.f32 %v3332_v6, %v3299_v23  ;;  %2430 = vmatpush3.bf16.msra.mxu0 %v2634_v47  ;;  %v2635_v7 = vld [vmem:[#allocation7 + $0x28] sm:$0xff]   ;;  %v2636_v23 = vld [vmem:[#allocation7 + $0x20] sm:$0xff]   ;;  %v2637_v6 = vld [vmem:[#allocation7 + $0x18] sm:$0xff]  }
 0x1e0   : > { %2400 = vmatmul.mubr.bf16.gmra.mxu1 %v854_v60  ;;  %v861_v12 = vpack.c.bf16 %v840_v29, %v839_v40  ;;  %v844_v41 = vadd.f32 %v3334_v10, %v808_v16  ;;  %v862_v31 = vpack.c.bf16 %v842_v37, %v841_v34  ;;  %2431 = vmatprep.subr.bf16.mxu0 %v2635_v7  ;;  %v885_v46 = vsub.s32 3, %v3129_v63 }
 0x1e1   : > { %2403 = vmatprep.mubr.bf16.mxu1 %v855_v53  ;;  %v845_v8 = vadd.f32 %v3334_v10, %v809_v45  ;;  %v846_v42 = vadd.f32 %v3334_v10, %v810_v54  ;;  %v2638_v10 = vld [vmem:[#allocation7 + $0x10] sm:$0xff]  }
 0x1e2   : > { %v863_v35 = vpack.c.bf16 %v844_v41, %v843_v39  ;;  %v3442_v49 = vrot.slane %v3132_v3, %v885_v46 }
 0x1e3   : > { %v864_v43 = vpack.c.bf16 %v846_v42, %v845_v8  ;;  %2432 = vmatpush3.bf16.msra.mxu0 %v2635_v7 }
 0x1e4   : > { %2433 = vmatprep.subr.bf16.mxu0 %v2636_v23 }
 0x1e7   : > { %2434 = vmatpush3.bf16.msra.mxu0 %v2636_v23 }
 0x1e8   : > { %2404 = vmatmul.mubr.bf16.gmra.mxu1 %v856_v59  ;;  %2435 = vmatprep.subr.bf16.mxu0 %v2637_v6 }
 0x1e9   : > { %2407 = vmatprep.mubr.bf16.mxu1 %v857_v18 }
 0x1eb   : > { %2436 = vmatpush3.bf16.msra.mxu0 %v2637_v6 }
 0x1ec   : > { %2437 = vmatprep.subr.bf16.mxu0 %v2638_v10 }
 0x1ef   : > { %2438 = vmatpush3.bf16.msra.mxu0 %v2638_v10 }
 0x1f0   : > { %2408 = vmatmul.mubr.bf16.gmra.mxu1 %v858_v32  ;;  %2439 = vmatprep.subr.bf16.mxu0 %v2639_v52 }
 0x1f1   : > { %2411 = vmatprep.mubr.bf16.mxu1 %v859_v17 }
 0x1f3   : > { %2440 = vmatpush3.bf16.msra.mxu0 %v2639_v52 }
 0x1f4   : > { %2441 = vmatprep.subr.bf16.mxu0 %v2640_v1 }
 0x1f7   : > { %2442 = vmatpush3.bf16.msra.mxu0 %v2640_v1 }
 0x1f8   : > { %2412 = vmatmul.mubr.bf16.gmra.mxu1 %v860_v57 }
 0x1f9   : > { %2415 = vmatprep.mubr.bf16.mxu1 %v861_v12 }
 0x200   : > { %2416 = vmatmul.mubr.bf16.gmra.mxu1 %v862_v31 }
 0x201   : > { %2419 = vmatprep.mubr.bf16.mxu1 %v863_v35 }
 0x208   : > { %2420 = vmatmul.mubr.bf16.gmra.mxu1 %v864_v43 }
 0x209   : > { %2423 = vmatprep.mubr.bf16.mxu1 %v865_v50 }
 0x210   : > { %2424 = vmatmul.mubr.bf16.gmra.mxu1 %v866_v51 }
 0x298   : > { %v2397_v36 = vpop.f32.mrf.mxu1 }
 0x299   : > { %v978_v53 = vadd.f32 %v2397_v36, %v3442_v49 }
 0x29a   : > { %v969_v60 = vpop.f32.mrf.mxu1 }
 0x29b   : > { %v970_v50 = vadd.f32 %v969_v60, %v3442_v49  ;;  %v3450_v11 = vmax.f32 %v978_v53, 0.0 }
 0x29c   : > { %v2398_v51 = vpop.f32.mrf.mxu1 }
 0x29d   : > { %v981_v55 = vadd.f32 %v2398_v51, %v3442_v49  ;;  %v3447_v5 = vmax.f32 %v970_v50, 0.0  ;;  %v1168_v22 = vmul.f32 %v3450_v11, %v3450_v11 }
 0x29e   : > { %v972_v56 = vpop.f32.mrf.mxu1 }
 0x29f   : > { %v973_v62 = vadd.f32 %v972_v56, %v3442_v49  ;;  %v3454_v3 = vmax.f32 %v981_v55, 0.0  ;;  %v1166_v59 = vmul.f32 %v3447_v5, %v3447_v5 }
 0x2a0   : > { %v2401_v0 = vpop.f32.mrf.mxu1 }
 0x2a1   : > { %v3452_v13 = vmax.f32 %v973_v62, 0.0  ;;  %v994_v33 = vadd.f32 %v2401_v0, %v3442_v49  ;;  %v1169_v32 = vmul.f32 %v3454_v3, %v3454_v3 }
 0x2a2   : > { %v985_v14 = vpop.f32.mrf.mxu1 }
 0x2a3   : > { %v1128_v18 = vadd.f32 %v3452_v13, %v3447_v5  ;;  %v1167_v4 = vmul.f32 %v3452_v13, %v3452_v13  ;;  %v986_v19 = vadd.f32 %v985_v14, %v3442_v49  ;;  %v3474_v28 = vmax.f32 %v994_v33, 0.0 }
 0x2a4   : > { %v2402_v20 = vpop.f32.mrf.mxu1 }
 0x2a5   : > { %v1129_v24 = vadd.f32 %v1128_v18, %v3450_v11  ;;  %v1198_v25 = vadd.f32 %v1167_v4, %v1166_v59  ;;  %v3467_v15 = vmax.f32 %v986_v19, 0.0  ;;  %v997_v58 = vadd.f32 %v2402_v20, %v3442_v49 }
 0x2a6   : > { %v988_v17 = vpop.f32.mrf.mxu1  ;;  %v1172_v31 = vmul.f32 %v3474_v28, %v3474_v28 }
 0x2a7   : > { %v1199_v38 = vadd.f32 %v1198_v25, %v1168_v22  ;;  %v1130_v48 = vadd.f32 %v1129_v24, %v3454_v3  ;;  %v989_v26 = vadd.f32 %v988_v17, %v3442_v49  ;;  %v1170_v29 = vmul.f32 %v3467_v15, %v3467_v15 }
 0x2a8   : > { %v2405_v27 = vpop.f32.mrf.mxu1  ;;  %v3481_v30 = vmax.f32 %v997_v58, 0.0 }
 0x2a9   : > { %v1131_v40 = vadd.f32 %v1130_v48, %v3467_v15  ;;  %v1200_v57 = vadd.f32 %v1199_v38, %v1169_v32  ;;  %v3479_v12 = vmax.f32 %v989_v26, 0.0  ;;  %v1010_v37 = vadd.f32 %v2405_v27, %v3442_v49 }
 0x2aa   : > { %v1001_v9 = vpop.f32.mrf.mxu1  ;;  %v1173_v43 = vmul.f32 %v3481_v30, %v3481_v30 }
 0x2ab   : > { %v1201_v21 = vadd.f32 %v1200_v57, %v1170_v29  ;;  %v1132_v16 = vadd.f32 %v1131_v40, %v3479_v12  ;;  %v1171_v34 = vmul.f32 %v3479_v12, %v3479_v12  ;;  %v1002_v39 = vadd.f32 %v1001_v9, %v3442_v49 }
 0x2ac   : > { %v2406_v41 = vpop.f32.mrf.mxu1  ;;  %v3498_v23 = vmax.f32 %v1010_v37, 0.0 }
 0x2ad   : > { %v1133_v35 = vadd.f32 %v1132_v16, %v3474_v28  ;;  %v1202_v45 = vadd.f32 %v1201_v21, %v1171_v34  ;;  %v3491_v54 = vmax.f32 %v1002_v39, 0.0  ;;  %v1013_v8 = vadd.f32 %v2406_v41, %v3442_v49 }
 0x2ae   : > { %v1004_v42 = vpop.f32.mrf.mxu1  ;;  %v1176_v62 = vmul.f32 %v3498_v23, %v3498_v23 }
 0x2af   : > { %v1203_v44 = vadd.f32 %v1202_v45, %v1172_v31  ;;  %v1134_v47 = vadd.f32 %v1133_v35, %v3481_v30  ;;  %v1005_v7 = vadd.f32 %v1004_v42, %v3442_v49  ;;  %v1174_v52 = vmul.f32 %v3491_v54, %v3491_v54 }
 0x2b0   : > { %v2409_v6 = vpop.f32.mrf.mxu1  ;;  %v3505_v36 = vmax.f32 %v1013_v8, 0.0 }
 0x2b1   : > { %v1135_v10 = vadd.f32 %v1134_v47, %v3491_v54  ;;  %v1204_v46 = vadd.f32 %v1203_v44, %v1173_v43  ;;  %v3503_v1 = vmax.f32 %v1005_v7, 0.0  ;;  %v1026_v18 = vadd.f32 %v2409_v6, %v3442_v49 }
 0x2b2   : > { %v1017_v60 = vpop.f32.mrf.mxu1  ;;  %v1177_v19 = vmul.f32 %v3505_v36, %v3505_v36 }
 0x2b3   : > { %v1205_v50 = vadd.f32 %v1204_v46, %v1174_v52  ;;  %v1136_v51 = vadd.f32 %v1135_v10, %v3503_v1  ;;  %v1175_v53 = vmul.f32 %v3503_v1, %v3503_v1  ;;  %v1018_v55 = vadd.f32 %v1017_v60, %v3442_v49 }
 0x2b4   : > { %v2410_v56 = vpop.f32.mrf.mxu1  ;;  %v3525_v48 = vmax.f32 %v1026_v18, 0.0 }
 0x2b5   : > { %v1137_v0 = vadd.f32 %v1136_v51, %v3498_v23  ;;  %v1206_v14 = vadd.f32 %v1205_v50, %v1175_v53  ;;  %v3514_v59 = vmax.f32 %v1018_v55, 0.0  ;;  %v1029_v22 = vadd.f32 %v2410_v56, %v3442_v49 }
 0x2b6   : > { %v1020_v4 = vpop.f32.mrf.mxu1  ;;  %v1180_v34 = vmul.f32 %v3525_v48, %v3525_v48 }
 0x2b7   : > { %v1207_v33 = vadd.f32 %v1206_v14, %v1176_v62  ;;  %v1138_v20 = vadd.f32 %v1137_v0, %v3505_v36  ;;  %v1021_v24 = vadd.f32 %v1020_v4, %v3442_v49  ;;  %v1178_v17 = vmul.f32 %v3514_v59, %v3514_v59 }
 0x2b8   : > { %v2413_v25 = vpop.f32.mrf.mxu1  ;;  %v3530_v29 = vmax.f32 %v1029_v22, 0.0 }
 0x2b9   : > { %v1139_v32 = vadd.f32 %v1138_v20, %v3514_v59  ;;  %v1208_v38 = vadd.f32 %v1207_v33, %v1177_v19  ;;  %v3527_v58 = vmax.f32 %v1021_v24, 0.0  ;;  %v1042_v16 = vadd.f32 %v2413_v25, %v3442_v49 }
 0x2ba   : > { %v1033_v26 = vpop.f32.mrf.mxu1  ;;  %v1181_v45 = vmul.f32 %v3530_v29, %v3530_v29 }
 0x2bb   : > { %v1209_v27 = vadd.f32 %v1208_v38, %v1178_v17  ;;  %v1034_v40 = vadd.f32 %v1033_v26, %v3442_v49  ;;  %v1140_v57 = vadd.f32 %v1139_v32, %v3527_v58  ;;  %v1179_v9 = vmul.f32 %v3527_v58, %v3527_v58 }
 0x2bc   : > { %v2414_v21 = vpop.f32.mrf.mxu1  ;;  %v3546_v47 = vmax.f32 %v1042_v16, 0.0 }
 0x2bd   : > { %v1141_v37 = vadd.f32 %v1140_v57, %v3525_v48  ;;  %v1210_v39 = vadd.f32 %v1209_v27, %v1179_v9  ;;  %v3539_v41 = vmax.f32 %v1034_v40, 0.0  ;;  %v1045_v43 = vadd.f32 %v2414_v21, %v3442_v49 }
 0x2be   : > { %v1036_v31 = vpop.f32.mrf.mxu1  ;;  %v1184_v62 = vmul.f32 %v3546_v47, %v3546_v47 }
 0x2bf   : > { %v1037_v35 = vadd.f32 %v1036_v31, %v3442_v49  ;;  %v1211_v8 = vadd.f32 %v1210_v39, %v1180_v34  ;;  %v1142_v42 = vadd.f32 %v1141_v37, %v3530_v29  ;;  %v1182_v10 = vmul.f32 %v3539_v41, %v3539_v41 }
 0x2c0   : > { %v2417_v44 = vpop.f32.mrf.mxu1  ;;  %v3556_v53 = vmax.f32 %v1045_v43, 0.0 }
 0x2c1   : > { %v3548_v7 = vmax.f32 %v1037_v35, 0.0  ;;  %v1143_v6 = vadd.f32 %v1142_v42, %v3539_v41  ;;  %v1212_v52 = vadd.f32 %v1211_v8, %v1181_v45  ;;  %v1058_v18 = vadd.f32 %v2417_v44, %v3442_v49 }
 0x2c2   : > { %v1049_v46 = vpop.f32.mrf.mxu1  ;;  %v1185_v20 = vmul.f32 %v3556_v53, %v3556_v53 }
 0x2c3   : > { %v1183_v60 = vmul.f32 %v3548_v7, %v3548_v7  ;;  %v1050_v50 = vadd.f32 %v1049_v46, %v3442_v49  ;;  %v1213_v51 = vadd.f32 %v1212_v52, %v1182_v10  ;;  %v1144_v55 = vadd.f32 %v1143_v6, %v3548_v7 }
 0x2c4   : > { %v2418_v56 = vpop.f32.mrf.mxu1  ;;  %v3572_v38 = vmax.f32 %v1058_v18, 0.0 }
 0x2c5   : > { %v1145_v0 = vadd.f32 %v1144_v55, %v3546_v47  ;;  %v1214_v14 = vadd.f32 %v1213_v51, %v1183_v60  ;;  %v3563_v4 = vmax.f32 %v1050_v50, 0.0  ;;  %v1061_v25 = vadd.f32 %v2418_v56, %v3442_v49 }
 0x2c6   : > { %v1052_v19 = vpop.f32.mrf.mxu1  ;;  %v1188_v35 = vmul.f32 %v3572_v38, %v3572_v38 }
 0x2c7   : > { %v1053_v33 = vadd.f32 %v1052_v19, %v3442_v49  ;;  %v1215_v22 = vadd.f32 %v1214_v14, %v1184_v62  ;;  %v1146_v24 = vadd.f32 %v1145_v0, %v3556_v53  ;;  %v1186_v27 = vmul.f32 %v3563_v4, %v3563_v4 }
 0x2c8   : > { %v2421_v32 = vpop.f32.mrf.mxu1  ;;  %v3580_v34 = vmax.f32 %v1061_v25, 0.0 }
 0x2c9   : > { %v3570_v17 = vmax.f32 %v1053_v33, 0.0  ;;  %v1147_v26 = vadd.f32 %v1146_v24, %v3563_v4  ;;  %v1216_v40 = vadd.f32 %v1215_v22, %v1185_v20  ;;  %v1074_v31 = vadd.f32 %v2421_v32, %v3442_v49 }
 0x2ca   : > { %v1065_v57 = vpop.f32.mrf.mxu1  ;;  %v1189_v6 = vmul.f32 %v3580_v34, %v3580_v34 }
 0x2cb   : > { %v1187_v9 = vmul.f32 %v3570_v17, %v3570_v17  ;;  %v1066_v21 = vadd.f32 %v1065_v57, %v3442_v49  ;;  %v1217_v16 = vadd.f32 %v1216_v40, %v1186_v27  ;;  %v1148_v37 = vadd.f32 %v1147_v26, %v3570_v17 }
 0x2cc   : > { %v2422_v39 = vpop.f32.mrf.mxu1  ;;  %v3594_v50 = vmax.f32 %v1074_v31, 0.0 }
 0x2cd   : > { %v1149_v45 = vadd.f32 %v1148_v37, %v3572_v38  ;;  %v1218_v8 = vadd.f32 %v1217_v16, %v1187_v9  ;;  %v3587_v42 = vmax.f32 %v1066_v21, 0.0  ;;  %v1077_v46 = vadd.f32 %v2422_v39, %v3442_v49 }
 0x2ce   : > { %v1068_v43 = vpop.f32.mrf.mxu1  ;;  %v1192_v24 = vmul.f32 %v3594_v50, %v3594_v50 }
 0x2cf   : > { %v1069_v44 = vadd.f32 %v1068_v43, %v3442_v49  ;;  %v1219_v10 = vadd.f32 %v1218_v8, %v1188_v35  ;;  %v1150_v52 = vadd.f32 %v1149_v45, %v3580_v34  ;;  %v1190_v56 = vmul.f32 %v3587_v42, %v3587_v42 }
 0x2d0   : > { %v2425_v60 = vpop.f32.mrf.mxu1  ;;  %v3604_v33 = vmax.f32 %v1077_v46, 0.0 }
 0x2d1   : > { %v3596_v51 = vmax.f32 %v1069_v44, 0.0  ;;  %v1151_v55 = vadd.f32 %v1150_v52, %v3587_v42  ;;  %v1220_v62 = vadd.f32 %v1219_v10, %v1189_v6  ;;  %v1090_v26 = vadd.f32 %v2425_v60, %v3442_v49 }
 0x2d2   : > { %v1081_v0 = vpop.f32.mrf.mxu1  ;;  %v1193_v9 = vmul.f32 %v3604_v33, %v3604_v33 }
 0x2d3   : > { %v1191_v14 = vmul.f32 %v3596_v51, %v3596_v51  ;;  %v1082_v18 = vadd.f32 %v1081_v0, %v3442_v49  ;;  %v1221_v19 = vadd.f32 %v1220_v62, %v1190_v56  ;;  %v1152_v20 = vadd.f32 %v1151_v55, %v3596_v51 }
 0x2d4   : > { %v2426_v22 = vpop.f32.mrf.mxu1  ;;  %v3620_v31 = vmax.f32 %v1090_v26, 0.0 }
 0x2d5   : > { %v1153_v25 = vadd.f32 %v1152_v20, %v3594_v50  ;;  %v1222_v32 = vadd.f32 %v1221_v19, %v1191_v14  ;;  %v3611_v27 = vmax.f32 %v1082_v18, 0.0  ;;  %v1093_v37 = vadd.f32 %v2426_v22, %v3442_v49 }
 0x2d6   : > { %v1084_v40 = vpop.f32.mrf.mxu1 }
 0x2d7   : > { %v1085_v57 = vadd.f32 %v1084_v40, %v3442_v49  ;;  %v1223_v21 = vadd.f32 %v1222_v32, %v1192_v24  ;;  %v1154_v16 = vadd.f32 %v1153_v25, %v3604_v33  ;;  %v1194_v45 = vmul.f32 %v3611_v27, %v3611_v27 }
 0x2d8   : > { %v3627_v6 = vmax.f32 %v1093_v37, 0.0  ;;  %v1196_v49 = vmul.f32 %v3620_v31, %v3620_v31 }
 0x2d9   : > { %v3618_v39 = vmax.f32 %v1085_v57, 0.0  ;;  %v1155_v35 = vadd.f32 %v1154_v16, %v3611_v27  ;;  %v1224_v8 = vadd.f32 %v1223_v21, %v1193_v9 }
 0x2da   : > { %v1197_v60 = vmul.f32 %v3627_v6, %v3627_v6 }
 0x2db   : > { %v1195_v43 = vmul.f32 %v3618_v39, %v3618_v39  ;;  %v1225_v44 = vadd.f32 %v1224_v8, %v1194_v45  ;;  %v1156_v10 = vadd.f32 %v1155_v35, %v3618_v39 }
 0x2dd   : > { %v1157_v52 = vadd.f32 %v1156_v10, %v3620_v31  ;;  %v1226_v46 = vadd.f32 %v1225_v44, %v1195_v43  ;;  %v3636_v43 = vld [vmem:[#allocation10] sm:$0xff] }
 0x2df   : > { %v1158_v55 = vadd.f32 %v1157_v52, %v3627_v6  ;;  %v1227_v56 = vadd.f32 %v1226_v46, %v1196_v49  ;;  %v1249_v49 = vsub.s32 4, %v3129_v63  ;;  %v1285_v46 = vsub.s32 5, %v3129_v63 }
 0x2e1   : > { %v1159_v62 = vrot.slane %v1158_v55, 4  ;;  %v1228_v0 = vadd.f32 %v1227_v56, %v1197_v60 }
 0x2e3   : > { %v1160_v14 = vadd.f32 %v1159_v62, %v1158_v55  ;;  %v1229_v18 = vrot.slane %v1228_v0, 4 }
 0x2e5   : > { %v1161_v19 = vrot.slane %v1160_v14, 2  ;;  %v1230_v20 = vadd.f32 %v1229_v18, %v1228_v0 }
 0x2e7   : > { %v1162_v22 = vadd.f32 %v1161_v19, %v1160_v14  ;;  %v1231_v24 = vrot.slane %v1230_v20, 2 }
 0x2e9   : > { %v1163_v25 = vrot.slane %v1162_v22, 1  ;;  %v1232_v32 = vadd.f32 %v1231_v24, %v1230_v20 }
 0x2eb   : > { %v1164_v26 = vadd.f32 %v1163_v25, %v1162_v22  ;;  %v1233_v40 = vrot.slane %v1232_v32, 1 }
 0x2ed   : > { %v1165_v57 = vmul.f32 0.00390625, %v1164_v26  ;;  %v1234_v9 = vadd.f32 %v1233_v40, %v1232_v32 }
 0x2ef   : > { %v1235_v21 = vmul.f32 0.00390625, %v1234_v9  ;;  %v1236_v16 = vmul.f32 %v1165_v57, %v1165_v57 }
 0x2f1   : > { %v1237_v37 = vsub.f32 %v1235_v21, %v1236_v16 }
 0x2f3   : > { %v1238_v35 = vmax.f32 %v1237_v37, 0.0 }
 0x2f5   : > { %v1239_v45 = vadd.f32 1e-05, %v1238_v35 }
 0x2f7   : > { %2651 = vrsqrt.f32 %v1239_v45 }
 0x304   : > { %v2652_v8 = vpop.eup %2651 }
 0x305   : > { %v1241_v44 = vmul.f32 %v3636_v43, %v2652_v8 }
 0x307   : > { %v1242_v10 = vmul.f32 %v1241_v44, %v1165_v57  ;;  %v3642_v55 = vrot.slane %v1241_v44, %v1249_v49 }
 0x309   : > { %v1244_v52 = vrot.slane %v1242_v10, 7  ;;  %v1253_v62 = vmul.f32 %v3642_v55, %v3450_v11  ;;  %v1251_v0 = vmul.f32 %v3642_v55, %v3447_v5  ;;  %v1252_v14 = vmul.f32 %v3642_v55, %v3452_v13 }
 0x30a   : > { %v1254_v18 = vmul.f32 %v3642_v55, %v3454_v3  ;;  %v1255_v19 = vmul.f32 %v3642_v55, %v3467_v15  ;;  %v1256_v20 = vmul.f32 %v3642_v55, %v3479_v12  ;;  %v1257_v15 = vmul.f32 %v3642_v55, %v3474_v28 }
 0x30b   : > { %v1246_v60 = vsub.f32 %v3636_v43, %v1244_v52  ;;  %v1258_v12 = vmul.f32 %v3642_v55, %v3481_v30  ;;  %v1259_v40 = vmul.f32 %v3642_v55, %v3491_v54  ;;  %v1260_v57 = vmul.f32 %v3642_v55, %v3503_v1 }
 0x30c   : > { %v1280_v9 = vmul.f32 %v3642_v55, %v3618_v39  ;;  %v1279_v21 = vmul.f32 %v3642_v55, %v3611_v27  ;;  %v1281_v30 = vmul.f32 %v3642_v55, %v3620_v31  ;;  %v1282_v54 = vmul.f32 %v3642_v55, %v3627_v6 }
 0x30d   : > { %v3644_v56 = vrot.slane %v1246_v60, %v1285_v46  ;;  %v1261_v10 = vmul.f32 %v3642_v55, %v3498_v23  ;;  %v1262_v49 = vmul.f32 %v3642_v55, %v3505_v36  ;;  %v1263_v52 = vmul.f32 %v3642_v55, %v3514_v59 }
 0x30e   : > { %v1264_v46 = vmul.f32 %v3642_v55, %v3527_v58  ;;  %v1265_v36 = vmul.f32 %v3642_v55, %v3525_v48  ;;  %v1266_v59 = vmul.f32 %v3642_v55, %v3530_v29  ;;  %v1267_v58 = vmul.f32 %v3642_v55, %v3539_v41 }
 0x30f   : > { %v1289_v22 = vadd.f32 %v3644_v56, %v1253_v62  ;;  %v1290_v24 = vadd.f32 %v3644_v56, %v1254_v18  ;;  %v1287_v11 = vadd.f32 %v3644_v56, %v1251_v0  ;;  %v1288_v5 = vadd.f32 %v3644_v56, %v1252_v14 }
 0x310   : > { %v1291_v25 = vadd.f32 %v3644_v56, %v1255_v19  ;;  %v1292_v13 = vadd.f32 %v3644_v56, %v1256_v20  ;;  %v1293_v16 = vadd.f32 %v3644_v56, %v1257_v15  ;;  %v1294_v28 = vadd.f32 %v3644_v56, %v1258_v12 }
 0x311   : > { %v1320_v32 = vpack.c.bf16 %v1290_v24, %v1289_v22  ;;  %v1319_v3 = vpack.c.bf16 %v1288_v5, %v1287_v11  ;;  %v1295_v37 = vadd.f32 %v3644_v56, %v1259_v40  ;;  %v1296_v1 = vadd.f32 %v3644_v56, %v1260_v57 }
 0x312   : > { %v1321_v26 = vpack.c.bf16 %v1292_v13, %v1291_v25  ;;  %v3685_v35 = vadd.f32 %v3644_v56, %v1279_v21  ;;  %v3688_v39 = vadd.f32 %v3644_v56, %v1280_v9  ;;  %v3691_v27 = vadd.f32 %v3644_v56, %v1281_v30 }
 0x313   : > { %2443 = vmatprep.mubr.bf16.mxu0 %v1319_v3  ;;  %v1318_v45 = vadd.f32 %v3644_v56, %v1282_v54  ;;  %v1322_v8 = vpack.c.bf16 %v1294_v28, %v1293_v16  ;;  %v1323_v31 = vpack.c.bf16 %v1296_v1, %v1295_v37  ;;  %v1297_v60 = vadd.f32 %v3644_v56, %v1261_v10  ;;  %v2641_v54 = vld [vmem:[#allocation9 + $0x38] sm:$0xff]   ;;  %v2642_v37 = vld [vmem:[#allocation9 + $0x30] sm:$0xff]   ;;  %v2647_v1 = vld [vmem:[#allocation9 + $0x8] sm:$0xff]  }
 0x314   : > { %2444 = vmatmul.mubr.bf16.vlgmr.msra.gmra.mxu0 %v1320_v32  ;;  %v1333_v6 = vpack.c.bf16 %v3688_v39, %v3685_v35  ;;  %v1298_v62 = vadd.f32 %v3644_v56, %v1262_v49  ;;  %v1299_v0 = vadd.f32 %v3644_v56, %v1263_v52  ;;  %v1300_v14 = vadd.f32 %v3644_v56, %v1264_v46  ;;  %v2648_v39 = vld [vmem:[#allocation9] sm:$0xff]  }
 0x315   : > { %2447 = vmatprep.mubr.bf16.mxu0 %v1321_v26  ;;  %v1334_v44 = vpack.c.bf16 %v1318_v45, %v3691_v27  ;;  %v1268_v19 = vmul.f32 %v3642_v55, %v3548_v7  ;;  %v1301_v20 = vadd.f32 %v3644_v56, %v1265_v36  ;;  %v1302_v22 = vadd.f32 %v3644_v56, %v1266_v59 }
 0x316   : > { %v1324_v23 = vpack.c.bf16 %v1298_v62, %v1297_v60  ;;  %v1325_v18 = vpack.c.bf16 %v1300_v14, %v1299_v0  ;;  %v1303_v24 = vadd.f32 %v3644_v56, %v1267_v58  ;;  %v1269_v29 = vmul.f32 %v3642_v55, %v3546_v47  ;;  %2475 = vmatprep.subr.bf16.mxu1 %v2641_v54 }
 0x317   : > { %v1304_v11 = vadd.f32 %v3644_v56, %v1268_v19  ;;  %v1326_v48 = vpack.c.bf16 %v1302_v22, %v1301_v20  ;;  %v1270_v41 = vmul.f32 %v3642_v55, %v3556_v53  ;;  %v1271_v7 = vmul.f32 %v3642_v55, %v3563_v4  ;;  %2476 = vmatpush3.bf16.msra.mxu1 %v2641_v54 }
 0x318   : > { %v1272_v25 = vmul.f32 %v3642_v55, %v3570_v17  ;;  %v1305_v13 = vadd.f32 %v3644_v56, %v1269_v29  ;;  %v1273_v53 = vmul.f32 %v3642_v55, %v3572_v38  ;;  %v1274_v4 = vmul.f32 %v3642_v55, %v3580_v34  ;;  %2477 = vmatprep.subr.bf16.mxu1 %v2642_v37 }
 0x319   : > { %v1327_v5 = vpack.c.bf16 %v1304_v11, %v1303_v24  ;;  %v1306_v32 = vadd.f32 %v3644_v56, %v1270_v41  ;;  %v1307_v3 = vadd.f32 %v3644_v56, %v1271_v7  ;;  %v1275_v17 = vmul.f32 %v3642_v55, %v3587_v42 }
 0x31a   : > { %v1308_v26 = vadd.f32 %v3644_v56, %v1272_v25  ;;  %v1276_v12 = vmul.f32 %v3642_v55, %v3596_v51  ;;  %v1309_v40 = vadd.f32 %v3644_v56, %v1273_v53  ;;  %v1310_v57 = vadd.f32 %v3644_v56, %v1274_v4 }
 0x31b   : > { %v1328_v47 = vpack.c.bf16 %v1306_v32, %v1305_v13  ;;  %v1311_v9 = vadd.f32 %v3644_v56, %v1275_v17  ;;  %v1277_v34 = vmul.f32 %v3642_v55, %v3594_v50  ;;  %v1278_v42 = vmul.f32 %v3642_v55, %v3604_v33  ;;  %2478 = vmatpush3.bf16.msra.mxu1 %v2642_v37  ;;  %v2643_v50 = vld [vmem:[#allocation9 + $0x28] sm:$0xff]   ;;  %v2644_v33 = vld [vmem:[#allocation9 + $0x20] sm:$0xff]   ;;  %v2645_v55 = vld [vmem:[#allocation9 + $0x18] sm:$0xff]  }
 0x31c   : > { %2448 = vmatmul.mubr.bf16.gmra.mxu0 %v1322_v8  ;;  %v1329_v15 = vpack.c.bf16 %v1308_v26, %v1307_v3  ;;  %v1312_v21 = vadd.f32 %v3644_v56, %v1276_v12  ;;  %v1330_v38 = vpack.c.bf16 %v1310_v57, %v1309_v40  ;;  %2479 = vmatprep.subr.bf16.mxu1 %v2643_v50  ;;  %v1353_v35 = vsub.s32 6, %v3129_v63 }
 0x31d   : > { %2451 = vmatprep.mubr.bf16.mxu0 %v1323_v31  ;;  %v1313_v51 = vadd.f32 %v3644_v56, %v1277_v34  ;;  %v1314_v28 = vadd.f32 %v3644_v56, %v1278_v42  ;;  %v2646_v56 = vld [vmem:[#allocation9 + $0x10] sm:$0xff]  }
 0x31e   : > { %v1331_v16 = vpack.c.bf16 %v1312_v21, %v1311_v9  ;;  %v3753_v45 = vrot.slane %v3636_v43, %v1353_v35 }
 0x31f   : > { %v1332_v30 = vpack.c.bf16 %v1314_v28, %v1313_v51  ;;  %2480 = vmatpush3.bf16.msra.mxu1 %v2643_v50 }
 0x320   : > { %2481 = vmatprep.subr.bf16.mxu1 %v2644_v33 }
 0x323   : > { %2482 = vmatpush3.bf16.msra.mxu1 %v2644_v33 }
 0x324   : > { %2452 = vmatmul.mubr.bf16.gmra.mxu0 %v1324_v23  ;;  %2483 = vmatprep.subr.bf16.mxu1 %v2645_v55 }
 0x325   : > { %2455 = vmatprep.mubr.bf16.mxu0 %v1325_v18 }
 0x327   : > { %2484 = vmatpush3.bf16.msra.mxu1 %v2645_v55 }
 0x328   : > { %2485 = vmatprep.subr.bf16.mxu1 %v2646_v56 }
 0x32b   : > { %2486 = vmatpush3.bf16.msra.mxu1 %v2646_v56 }
 0x32c   : > { %2456 = vmatmul.mubr.bf16.gmra.mxu0 %v1326_v48  ;;  %2487 = vmatprep.subr.bf16.mxu1 %v2647_v1 }
 0x32d   : > { %2459 = vmatprep.mubr.bf16.mxu0 %v1327_v5 }
 0x32f   : > { %2488 = vmatpush3.bf16.msra.mxu1 %v2647_v1 }
 0x330   : > { %2489 = vmatprep.subr.bf16.mxu1 %v2648_v39 }
 0x333   : > { %2490 = vmatpush3.bf16.msra.mxu1 %v2648_v39 }
 0x334   : > { %2460 = vmatmul.mubr.bf16.gmra.mxu0 %v1328_v47 }
 0x335   : > { %2463 = vmatprep.mubr.bf16.mxu0 %v1329_v15 }
 0x33c   : > { %2464 = vmatmul.mubr.bf16.gmra.mxu0 %v1330_v38 }
 0x33d   : > { %2467 = vmatprep.mubr.bf16.mxu0 %v1331_v16 }
 0x344   : > { %2468 = vmatmul.mubr.bf16.gmra.mxu0 %v1332_v30 }
 0x345   : > { %2471 = vmatprep.mubr.bf16.mxu0 %v1333_v6 }
 0x34c   : > { %2472 = vmatmul.mubr.bf16.gmra.mxu0 %v1334_v44 }
 0x3d4   : > { %v2445_v27 = vpop.f32.mrf.mxu0 }
 0x3d5   : > { %v1446_v44 = vadd.f32 %v2445_v27, %v3753_v45 }
 0x3d6   : > { %v1437_v8 = vpop.f32.mrf.mxu0 }
 0x3d7   : > { %v1438_v31 = vadd.f32 %v1437_v8, %v3753_v45  ;;  %v3761_v62 = vmax.f32 %v1446_v44, 0.0 }
 0x3d8   : > { %v2446_v6 = vpop.f32.mrf.mxu0 }
 0x3d9   : > { %v1449_v10 = vadd.f32 %v2446_v6, %v3753_v45  ;;  %v3758_v52 = vmax.f32 %v1438_v31, 0.0  ;;  %v1636_v22 = vmul.f32 %v3761_v62, %v3761_v62 }
 0x3da   : > { %v1440_v49 = vpop.f32.mrf.mxu0 }
 0x3db   : > { %v1441_v46 = vadd.f32 %v1440_v49, %v3753_v45  ;;  %v3765_v14 = vmax.f32 %v1449_v10, 0.0  ;;  %v1634_v18 = vmul.f32 %v3758_v52, %v3758_v52 }
 0x3dc   : > { %v2449_v60 = vpop.f32.mrf.mxu0 }
 0x3dd   : > { %v3763_v0 = vmax.f32 %v1441_v46, 0.0  ;;  %v1462_v19 = vadd.f32 %v2449_v60, %v3753_v45  ;;  %v1637_v5 = vmul.f32 %v3765_v14, %v3765_v14 }
 0x3de   : > { %v1453_v23 = vpop.f32.mrf.mxu0 }
 0x3df   : > { %v1596_v36 = vadd.f32 %v3763_v0, %v3758_v52  ;;  %v1635_v59 = vmul.f32 %v3763_v0, %v3763_v0  ;;  %v1454_v58 = vadd.f32 %v1453_v23, %v3753_v45  ;;  %v3785_v32 = vmax.f32 %v1462_v19, 0.0 }
 0x3e0   : > { %v2450_v20 = vpop.f32.mrf.mxu0 }
 0x3e1   : > { %v1597_v24 = vadd.f32 %v1596_v36, %v3761_v62  ;;  %v1666_v11 = vadd.f32 %v1635_v59, %v1634_v18  ;;  %v3778_v48 = vmax.f32 %v1454_v58, 0.0  ;;  %v1465_v25 = vadd.f32 %v2450_v20, %v3753_v45 }
 0x3e2   : > { %v1456_v29 = vpop.f32.mrf.mxu0  ;;  %v1640_v16 = vmul.f32 %v3785_v32, %v3785_v32 }
 0x3e3   : > { %v1667_v41 = vadd.f32 %v1666_v11, %v1636_v22  ;;  %v1598_v7 = vadd.f32 %v1597_v24, %v3765_v14  ;;  %v1457_v13 = vadd.f32 %v1456_v29, %v3753_v45  ;;  %v1638_v47 = vmul.f32 %v3778_v48, %v3778_v48 }
 0x3e4   : > { %v2453_v3 = vpop.f32.mrf.mxu0  ;;  %v3792_v12 = vmax.f32 %v1465_v25, 0.0 }
 0x3e5   : > { %v1599_v26 = vadd.f32 %v1598_v7, %v3778_v48  ;;  %v1668_v15 = vadd.f32 %v1667_v41, %v1637_v5  ;;  %v3790_v53 = vmax.f32 %v1457_v13, 0.0  ;;  %v1478_v9 = vadd.f32 %v2453_v3, %v3753_v45 }
 0x3e6   : > { %v1469_v4 = vpop.f32.mrf.mxu0  ;;  %v1641_v54 = vmul.f32 %v3792_v12, %v3792_v12 }
 0x3e7   : > { %v1669_v17 = vadd.f32 %v1668_v15, %v1638_v47  ;;  %v1600_v40 = vadd.f32 %v1599_v26, %v3790_v53  ;;  %v1639_v57 = vmul.f32 %v3790_v53, %v3790_v53  ;;  %v1470_v21 = vadd.f32 %v1469_v4, %v3753_v45 }
 0x3e8   : > { %v2454_v38 = vpop.f32.mrf.mxu0  ;;  %v3809_v55 = vmax.f32 %v1478_v9, 0.0 }
 0x3e9   : > { %v1601_v34 = vadd.f32 %v1600_v40, %v3785_v32  ;;  %v1670_v42 = vadd.f32 %v1669_v17, %v1639_v57  ;;  %v3802_v51 = vmax.f32 %v1470_v21, 0.0  ;;  %v1481_v28 = vadd.f32 %v2454_v38, %v3753_v45 }
 0x3ea   : > { %v1472_v30 = vpop.f32.mrf.mxu0  ;;  %v1644_v60 = vmul.f32 %v3809_v55, %v3809_v55 }
 0x3eb   : > { %v1671_v37 = vadd.f32 %v1670_v42, %v1640_v16  ;;  %v1602_v50 = vadd.f32 %v1601_v34, %v3792_v12  ;;  %v1473_v33 = vadd.f32 %v1472_v30, %v3753_v45  ;;  %v1642_v35 = vmul.f32 %v3802_v51, %v3802_v51 }
 0x3ec   : > { %v2457_v56 = vpop.f32.mrf.mxu0  ;;  %v3816_v8 = vmax.f32 %v1481_v28, 0.0 }
 0x3ed   : > { %v1603_v1 = vadd.f32 %v1602_v50, %v3802_v51  ;;  %v1672_v39 = vadd.f32 %v1671_v37, %v1641_v54  ;;  %v3814_v27 = vmax.f32 %v1473_v33, 0.0  ;;  %v1494_v59 = vadd.f32 %v2457_v56, %v3753_v45 }
 0x3ee   : > { %v1485_v31 = vpop.f32.mrf.mxu0  ;;  %v1645_v19 = vmul.f32 %v3816_v8, %v3816_v8 }
 0x3ef   : > { %v1673_v6 = vadd.f32 %v1672_v39, %v1642_v35  ;;  %v1604_v44 = vadd.f32 %v1603_v1, %v3814_v27  ;;  %v1643_v10 = vmul.f32 %v3814_v27, %v3814_v27  ;;  %v1486_v49 = vadd.f32 %v1485_v31, %v3753_v45 }
 0x3f0   : > { %v2458_v46 = vpop.f32.mrf.mxu0  ;;  %v3836_v25 = vmax.f32 %v1494_v59, 0.0 }
 0x3f1   : > { %v1605_v23 = vadd.f32 %v1604_v44, %v3809_v55  ;;  %v1674_v18 = vadd.f32 %v1673_v6, %v1643_v10  ;;  %v3825_v36 = vmax.f32 %v1486_v49, 0.0  ;;  %v1497_v24 = vadd.f32 %v2458_v46, %v3753_v45 }
 0x3f2   : > { %v1488_v58 = vpop.f32.mrf.mxu0  ;;  %v1648_v9 = vmul.f32 %v3836_v25, %v3836_v25 }
 0x3f3   : > { %v1675_v20 = vadd.f32 %v1674_v18, %v1644_v60  ;;  %v1606_v22 = vadd.f32 %v1605_v23, %v3816_v8  ;;  %v1489_v11 = vadd.f32 %v1488_v58, %v3753_v45  ;;  %v1646_v41 = vmul.f32 %v3825_v36, %v3825_v36 }
 0x3f4   : > { %v2461_v5 = vpop.f32.mrf.mxu0  ;;  %v3841_v15 = vmax.f32 %v1497_v24, 0.0 }
 0x3f5   : > { %v1607_v29 = vadd.f32 %v1606_v22, %v3825_v36  ;;  %v1676_v7 = vadd.f32 %v1675_v20, %v1645_v19  ;;  %v3838_v13 = vmax.f32 %v1489_v11, 0.0  ;;  %v1510_v57 = vadd.f32 %v2461_v5, %v3753_v45 }
 0x3f6   : > { %v1501_v3 = vpop.f32.mrf.mxu0  ;;  %v1649_v28 = vmul.f32 %v3841_v15, %v3841_v15 }
 0x3f7   : > { %v1677_v26 = vadd.f32 %v1676_v7, %v1646_v41  ;;  %v1502_v47 = vadd.f32 %v1501_v3, %v3753_v45  ;;  %v1608_v4 = vadd.f32 %v1607_v29, %v3838_v13  ;;  %v1647_v17 = vmul.f32 %v3838_v13, %v3838_v13 }
 0x3f8   : > { %v2462_v40 = vpop.f32.mrf.mxu0  ;;  %v3857_v33 = vmax.f32 %v1510_v57, 0.0 }
 0x3f9   : > { %v1609_v21 = vadd.f32 %v1608_v4, %v3836_v25  ;;  %v1678_v38 = vadd.f32 %v1677_v26, %v1647_v17  ;;  %v3850_v16 = vmax.f32 %v1502_v47, 0.0  ;;  %v1513_v37 = vadd.f32 %v2462_v40, %v3753_v45 }
 0x3fa   : > { %v1504_v34 = vpop.f32.mrf.mxu0  ;;  %v1652_v23 = vmul.f32 %v3857_v33, %v3857_v33 }
 0x3fb   : > { %v1505_v42 = vadd.f32 %v1504_v34, %v3753_v45  ;;  %v1679_v30 = vadd.f32 %v1678_v38, %v1648_v9  ;;  %v1610_v54 = vadd.f32 %v1609_v21, %v3841_v15  ;;  %v1650_v35 = vmul.f32 %v3850_v16, %v3850_v16 }
 0x3fc   : > { %v2465_v50 = vpop.f32.mrf.mxu0  ;;  %v3867_v49 = vmax.f32 %v1513_v37, 0.0 }
 0x3fd   : > { %v3859_v56 = vmax.f32 %v1505_v42, 0.0  ;;  %v1611_v1 = vadd.f32 %v1610_v54, %v3850_v16  ;;  %v1680_v39 = vadd.f32 %v1679_v30, %v1649_v28  ;;  %v1526_v58 = vadd.f32 %v2465_v50, %v3753_v45 }
 0x3fe   : > { %v1517_v31 = vpop.f32.mrf.mxu0  ;;  %v1653_v24 = vmul.f32 %v3867_v49, %v3867_v49 }
 0x3ff   : > { %v1651_v6 = vmul.f32 %v3859_v56, %v3859_v56  ;;  %v1518_v44 = vadd.f32 %v1517_v31, %v3753_v45  ;;  %v1681_v10 = vadd.f32 %v1680_v39, %v1650_v35  ;;  %v1612_v46 = vadd.f32 %v1611_v1, %v3859_v56 }
 0x400   : > { %v2466_v60 = vpop.f32.mrf.mxu0  ;;  %v3883_v3 = vmax.f32 %v1526_v58, 0.0 }
 0x401   : > { %v1613_v18 = vadd.f32 %v1612_v46, %v3857_v33  ;;  %v1682_v59 = vadd.f32 %v1681_v10, %v1651_v6  ;;  %v3874_v19 = vmax.f32 %v1518_v44, 0.0  ;;  %v1529_v29 = vadd.f32 %v2466_v60, %v3753_v45 }
 0x402   : > { %v1520_v20 = vpop.f32.mrf.mxu0  ;;  %v1656_v28 = vmul.f32 %v3883_v3, %v3883_v3 }
 0x403   : > { %v1521_v22 = vadd.f32 %v1520_v20, %v3753_v45  ;;  %v1683_v11 = vadd.f32 %v1682_v59, %v1652_v23  ;;  %v1614_v5 = vadd.f32 %v1613_v18, %v3867_v49  ;;  %v1654_v47 = vmul.f32 %v3874_v19, %v3874_v19 }
 0x404   : > { %v2469_v41 = vpop.f32.mrf.mxu0  ;;  %v3891_v21 = vmax.f32 %v1529_v29, 0.0 }
 0x405   : > { %v3881_v7 = vmax.f32 %v1521_v22, 0.0  ;;  %v1615_v26 = vadd.f32 %v1614_v5, %v3874_v19  ;;  %v1684_v4 = vadd.f32 %v1683_v11, %v1653_v24  ;;  %v1542_v42 = vadd.f32 %v2469_v41, %v3753_v45 }
 0x406   : > { %v1533_v17 = vpop.f32.mrf.mxu0  ;;  %v1657_v35 = vmul.f32 %v3891_v21, %v3891_v21 }
 0x407   : > { %v1655_v40 = vmul.f32 %v3881_v7, %v3881_v7  ;;  %v1534_v57 = vadd.f32 %v1533_v17, %v3753_v45  ;;  %v1685_v9 = vadd.f32 %v1684_v4, %v1654_v47  ;;  %v1616_v38 = vadd.f32 %v1615_v26, %v3881_v7 }
 0x408   : > { %v2470_v34 = vpop.f32.mrf.mxu0  ;;  %v3905_v10 = vmax.f32 %v1542_v42, 0.0 }
 0x409   : > { %v1617_v30 = vadd.f32 %v1616_v38, %v3883_v3  ;;  %v1686_v54 = vadd.f32 %v1685_v9, %v1655_v40  ;;  %v3898_v37 = vmax.f32 %v1534_v57, 0.0  ;;  %v1545_v6 = vadd.f32 %v2470_v34, %v3753_v45 }
 0x40a   : > { %v1536_v50 = vpop.f32.mrf.mxu0  ;;  %v1660_v29 = vmul.f32 %v3905_v10, %v3905_v10 }
 0x40b   : > { %v1537_v1 = vadd.f32 %v1536_v50, %v3753_v45  ;;  %v1687_v39 = vadd.f32 %v1686_v54, %v1656_v28  ;;  %v1618_v31 = vadd.f32 %v1617_v30, %v3891_v21  ;;  %v1658_v23 = vmul.f32 %v3898_v37, %v3898_v37 }
 0x40c   : > { %v2473_v44 = vpop.f32.mrf.mxu0  ;;  %v3915_v24 = vmax.f32 %v1545_v6, 0.0 }
 0x40d   : > { %v3907_v46 = vmax.f32 %v1537_v1, 0.0  ;;  %v1619_v60 = vadd.f32 %v1618_v31, %v3898_v37  ;;  %v1688_v18 = vadd.f32 %v1687_v39, %v1657_v35  ;;  %v1558_v47 = vadd.f32 %v2473_v44, %v3753_v45 }
 0x40e   : > { %v1549_v59 = vpop.f32.mrf.mxu0  ;;  %v1661_v57 = vmul.f32 %v3915_v24, %v3915_v24 }
 0x40f   : > { %v1659_v58 = vmul.f32 %v3907_v46, %v3907_v46  ;;  %v1550_v20 = vadd.f32 %v1549_v59, %v3753_v45  ;;  %v1689_v22 = vadd.f32 %v1688_v18, %v1658_v23  ;;  %v1620_v11 = vadd.f32 %v1619_v60, %v3907_v46 }
 0x410   : > { %v2474_v5 = vpop.f32.mrf.mxu0  ;;  %v3931_v28 = vmax.f32 %v1558_v47, 0.0 }
 0x411   : > { %v1621_v41 = vadd.f32 %v1620_v11, %v3905_v10  ;;  %v1690_v26 = vadd.f32 %v1689_v22, %v1659_v58  ;;  %v3922_v4 = vmax.f32 %v1550_v20, 0.0  ;;  %v1561_v34 = vadd.f32 %v2474_v5, %v3753_v45 }
 0x412   : > { %v1552_v17 = vpop.f32.mrf.mxu0 }
 0x413   : > { %v1553_v40 = vadd.f32 %v1552_v17, %v3753_v45  ;;  %v1691_v9 = vadd.f32 %v1690_v26, %v1660_v29  ;;  %v1622_v38 = vadd.f32 %v1621_v41, %v3915_v24  ;;  %v1662_v54 = vmul.f32 %v3922_v4, %v3922_v4 }
 0x414   : > { %v3938_v39 = vmax.f32 %v1561_v34, 0.0  ;;  %v1664_v45 = vmul.f32 %v3931_v28, %v3931_v28 }
 0x415   : > { %v3929_v42 = vmax.f32 %v1553_v40, 0.0  ;;  %v1623_v30 = vadd.f32 %v1622_v38, %v3922_v4  ;;  %v1692_v50 = vadd.f32 %v1691_v9, %v1661_v57 }
 0x416   : > { %v1665_v60 = vmul.f32 %v3938_v39, %v3938_v39 }
 0x417   : > { %v1663_v1 = vmul.f32 %v3929_v42, %v3929_v42  ;;  %v1693_v35 = vadd.f32 %v1692_v50, %v1662_v54  ;;  %v1624_v31 = vadd.f32 %v1623_v30, %v3929_v42 }
 0x419   : > { %v1625_v6 = vadd.f32 %v1624_v31, %v3931_v28  ;;  %v1694_v44 = vadd.f32 %v1693_v35, %v1663_v1 }
 0x41b   : > { %v1626_v23 = vadd.f32 %v1625_v6, %v3938_v39  ;;  %v1695_v18 = vadd.f32 %v1694_v44, %v1664_v45  ;;  %v1717_v45 = vsub.s32 7, %v3129_v63  ;;  %v3949_v6 = vld [vmem:[#allocation10 + $0x8] sm:$0x3] }
 0x41d   : > { %v1627_v59 = vrot.slane %v1626_v23, 4  ;;  %v1696_v58 = vadd.f32 %v1695_v18, %v1665_v60 }
 0x41f   : > { %v1628_v20 = vadd.f32 %v1627_v59, %v1626_v23  ;;  %v1697_v22 = vrot.slane %v1696_v58, 4 }
 0x421   : > { %v1629_v11 = vrot.slane %v1628_v20, 2  ;;  %v1698_v5 = vadd.f32 %v1697_v22, %v1696_v58 }
 0x423   : > { %v1630_v29 = vadd.f32 %v1629_v11, %v1628_v20  ;;  %v1699_v41 = vrot.slane %v1698_v5, 2 }
 0x425   : > { %v1631_v26 = vrot.slane %v1630_v29, 1  ;;  %v1700_v47 = vadd.f32 %v1699_v41, %v1698_v5 }
 0x427   : > { %v1632_v17 = vadd.f32 %v1631_v26, %v1630_v29  ;;  %v1701_v40 = vrot.slane %v1700_v47, 1 }
 0x429   : > { %v1633_v57 = vmul.f32 0.00390625, %v1632_v17  ;;  %v1702_v9 = vadd.f32 %v1701_v40, %v1700_v47 }
 0x42b   : > { %v1703_v38 = vmul.f32 0.00390625, %v1702_v9  ;;  %v1704_v34 = vmul.f32 %v1633_v57, %v1633_v57 }
 0x42d   : > { %v1705_v30 = vsub.f32 %v1703_v38, %v1704_v34 }
 0x42f   : > { %v1706_v54 = vmax.f32 %v1705_v30, 0.0 }
 0x431   : > { %v1707_v50 = vadd.f32 1e-05, %v1706_v54 }
 0x433   : > { %2653 = vrsqrt.f32 %v1707_v50 }
 0x440   : > { %v2654_v1 = vpop.eup %2653 }
 0x441   : > { %v1709_v35 = vmul.f32 %v3636_v43, %v2654_v1 }
 0x443   : > { %v1710_v31 = vmul.f32 %v1709_v35, %v1633_v57  ;;  %v3952_v23 = vrot.slane %v1709_v35, %v1717_v45 }
 0x445   : > { %v1712_v44 = vrot.slane %v1710_v31, 7  ;;  %v1721_v59 = vmul.f32 %v3952_v23, %v3761_v62  ;;  %v1719_v43 = vmul.f32 %v3952_v23, %v3758_v52  ;;  %v1720_v58 = vmul.f32 %v3952_v23, %v3763_v0 }
 0x446   : > { %v1722_v20 = vmul.f32 %v3952_v23, %v3765_v14  ;;  %v1723_v22 = vmul.f32 %v3952_v23, %v3778_v48  ;;  %v1724_v11 = vmul.f32 %v3952_v23, %v3790_v53  ;;  %v1725_v48 = vmul.f32 %v3952_v23, %v3785_v32 }
 0x447   : > { %v1714_v60 = vsub.f32 %v3949_v6, %v1712_v44  ;;  %v1726_v53 = vmul.f32 %v3952_v23, %v3792_v12  ;;  %v1727_v47 = vmul.f32 %v3952_v23, %v3802_v51  ;;  %v1728_v17 = vmul.f32 %v3952_v23, %v3814_v27 }
 0x448   : > { %v1748_v40 = vmul.f32 %v3952_v23, %v3929_v42  ;;  %v1747_v57 = vmul.f32 %v3952_v23, %v3922_v4  ;;  %v1749_v12 = vmul.f32 %v3952_v23, %v3931_v28  ;;  %v1750_v51 = vmul.f32 %v3952_v23, %v3938_v39 }
 0x449   : > { %v3956_v18 = vrot.slane %v1714_v60, %v416_v2  ;;  %v1729_v1 = vmul.f32 %v3952_v23, %v3809_v55  ;;  %v1730_v35 = vmul.f32 %v3952_v23, %v3816_v8  ;;  %v1731_v31 = vmul.f32 %v3952_v23, %v3825_v36 }
 0x44a   : > { %v1732_v45 = vmul.f32 %v3952_v23, %v3838_v13  ;;  %v1733_v8 = vmul.f32 %v3952_v23, %v3836_v25  ;;  %v1734_v36 = vmul.f32 %v3952_v23, %v3841_v15  ;;  %v1735_v13 = vmul.f32 %v3952_v23, %v3850_v16 }
 0x44b   : > { %v1757_v2 = vadd.f32 %v3956_v18, %v1721_v59  ;;  %v1758_v5 = vadd.f32 %v3956_v18, %v1722_v20  ;;  %v1755_v62 = vadd.f32 %v3956_v18, %v1719_v43  ;;  %v1756_v52 = vadd.f32 %v3956_v18, %v1720_v58 }
 0x44c   : > { %v1759_v29 = vadd.f32 %v3956_v18, %v1723_v22  ;;  %v1760_v0 = vadd.f32 %v3956_v18, %v1724_v11  ;;  %v1761_v9 = vadd.f32 %v3956_v18, %v1725_v48  ;;  %v1762_v32 = vadd.f32 %v3956_v18, %v1726_v53 }
 0x44d   : > { %v1788_v41 = vpack.c.bf16 %v1758_v5, %v1757_v2  ;;  %v1787_v14 = vpack.c.bf16 %v1756_v52, %v1755_v62  ;;  %v1763_v38 = vadd.f32 %v3956_v18, %v1727_v47  ;;  %v1764_v27 = vadd.f32 %v3956_v18, %v1728_v17 }
 0x44e   : > { %v1789_v26 = vpack.c.bf16 %v1760_v0, %v1759_v29  ;;  %v3997_v34 = vadd.f32 %v3956_v18, %v1747_v57  ;;  %v4000_v42 = vadd.f32 %v3956_v18, %v1748_v40  ;;  %v4003_v4 = vadd.f32 %v3956_v18, %v1749_v12 }
 0x44f   : > { %2491 = vmatprep.mubr.bf16.mxu1 %v1787_v14  ;;  %v1786_v30 = vadd.f32 %v3956_v18, %v1750_v51  ;;  %v1790_v54 = vpack.c.bf16 %v1762_v32, %v1761_v9  ;;  %v1791_v28 = vpack.c.bf16 %v1764_v27, %v1763_v38  ;;  %v1765_v44 = vadd.f32 %v3956_v18, %v1729_v1 }
 0x450   : > { %2492 = vmatmul.mubr.bf16.vlgmr.msra.gmra.mxu1 %v1788_v41  ;;  %v1801_v39 = vpack.c.bf16 %v4000_v42, %v3997_v34  ;;  %v1766_v60 = vadd.f32 %v3956_v18, %v1730_v35  ;;  %v1767_v59 = vadd.f32 %v3956_v18, %v1731_v31  ;;  %v1768_v43 = vadd.f32 %v3956_v18, %v1732_v45 }
 0x451   : > { %2495 = vmatprep.mubr.bf16.mxu1 %v1789_v26  ;;  %v1802_v50 = vpack.c.bf16 %v1786_v30, %v4003_v4  ;;  %v1736_v20 = vmul.f32 %v3952_v23, %v3859_v56  ;;  %v1769_v22 = vadd.f32 %v3956_v18, %v1733_v8  ;;  %v1770_v11 = vadd.f32 %v3956_v18, %v1734_v36 }
 0x452   : > { %v1792_v55 = vpack.c.bf16 %v1766_v60, %v1765_v44  ;;  %v1793_v58 = vpack.c.bf16 %v1768_v43, %v1767_v59  ;;  %v1771_v2 = vadd.f32 %v3956_v18, %v1735_v13  ;;  %v1737_v15 = vmul.f32 %v3952_v23, %v3857_v33 }
 0x453   : > { %v1772_v5 = vadd.f32 %v3956_v18, %v1736_v20  ;;  %v1794_v25 = vpack.c.bf16 %v1770_v11, %v1769_v22  ;;  %v1738_v16 = vmul.f32 %v3952_v23, %v3867_v49  ;;  %v1739_v56 = vmul.f32 %v3952_v23, %v3874_v19 }
 0x454   : > { %v1740_v52 = vmul.f32 %v3952_v23, %v3881_v7  ;;  %v1773_v29 = vadd.f32 %v3956_v18, %v1737_v15  ;;  %v1741_v49 = vmul.f32 %v3952_v23, %v3883_v3  ;;  %v1742_v19 = vmul.f32 %v3952_v23, %v3891_v21 }
 0x455   : > { %v1795_v62 = vpack.c.bf16 %v1772_v5, %v1771_v2  ;;  %v1774_v0 = vadd.f32 %v3956_v18, %v1738_v16  ;;  %v1775_v41 = vadd.f32 %v3956_v18, %v1739_v56  ;;  %v1743_v7 = vmul.f32 %v3952_v23, %v3898_v37 }
 0x456   : > { %v1776_v14 = vadd.f32 %v3956_v18, %v1740_v52  ;;  %v1744_v48 = vmul.f32 %v3952_v23, %v3907_v46  ;;  %v1777_v53 = vadd.f32 %v3956_v18, %v1741_v49  ;;  %v1778_v47 = vadd.f32 %v3956_v18, %v1742_v19 }
 0x457   : > { %v1796_v33 = vpack.c.bf16 %v1774_v0, %v1773_v29  ;;  %v1779_v17 = vadd.f32 %v3956_v18, %v1743_v7  ;;  %v1745_v21 = vmul.f32 %v3952_v23, %v3905_v10  ;;  %v1746_v37 = vmul.f32 %v3952_v23, %v3915_v24 }
 0x458   : > { %2496 = vmatmul.mubr.bf16.gmra.mxu1 %v1790_v54  ;;  %v1797_v26 = vpack.c.bf16 %v1776_v14, %v1775_v41  ;;  %v1780_v3 = vadd.f32 %v3956_v18, %v1744_v48  ;;  %v1798_v40 = vpack.c.bf16 %v1778_v47, %v1777_v53  ;;  %v4068_v10 = vrot.slane %v3949_v6, %v781_v61 }
 0x459   : > { %2499 = vmatprep.mubr.bf16.mxu1 %v1791_v28  ;;  %v1781_v46 = vadd.f32 %v3956_v18, %v1745_v21  ;;  %v1782_v9 = vadd.f32 %v3956_v18, %v1746_v37 }
 0x45a   : > { %v1799_v57 = vpack.c.bf16 %v1780_v3, %v1779_v17 }
 0x45b   : > { %v1800_v32 = vpack.c.bf16 %v1782_v9, %v1781_v46 }
 0x460   : > { %2500 = vmatmul.mubr.bf16.gmra.mxu1 %v1792_v55 }
 0x461   : > { %2503 = vmatprep.mubr.bf16.mxu1 %v1793_v58 }
 0x468   : > { %2504 = vmatmul.mubr.bf16.gmra.mxu1 %v1794_v25 }
 0x469   : > { %2507 = vmatprep.mubr.bf16.mxu1 %v1795_v62 }
 0x470   : > { %2508 = vmatmul.mubr.bf16.gmra.mxu1 %v1796_v33 }
 0x471   : > { %2511 = vmatprep.mubr.bf16.mxu1 %v1797_v26 }
 0x478   : > { %2512 = vmatmul.mubr.bf16.gmra.mxu1 %v1798_v40 }
 0x479   : > { %2515 = vmatprep.mubr.bf16.mxu1 %v1799_v57 }
 0x480   : > { %2516 = vmatmul.mubr.bf16.gmra.mxu1 %v1800_v32 }
 0x481   : > { %2519 = vmatprep.mubr.bf16.mxu1 %v1801_v39 }
 0x488   : > { %2520 = vmatmul.mubr.bf16.gmra.mxu1 %v1802_v50 }
 0x510   : > { %v2493_v24 = vpop.f32.mrf.mxu1 }
 0x511   : > { %v1914_v23 = vadd.f32 %v2493_v24, %v4068_v10 }
 0x512   : > { %v1905_v18 = vpop.f32.mrf.mxu1 }
 0x513   : > { %2034 = vst [vmem:[%s4073_s8 + $0x10] sm:$0xff] %v1914_v23  ;;  %v1906_v63 = vadd.f32 %v1905_v18, %v4068_v10 }
 0x514   : > { %v2494_v61 = vpop.f32.mrf.mxu1 }
 0x515   : > { %2032 = vst [vmem:[%s4073_s8] sm:$0xff] %v1906_v63  ;;  %v1917_v6 = vadd.f32 %v2494_v61, %v4068_v10 }
 0x516   : > { %v1908_v12 = vpop.f32.mrf.mxu1 }
 0x517   : > { %2035 = vst [vmem:[%s4073_s8 + $0x18] sm:$0xff] %v1917_v6  ;;  %v1909_v51 = vadd.f32 %v1908_v12, %v4068_v10 }
 0x518   : > { %v2497_v38 = vpop.f32.mrf.mxu1 }
 0x519   : > { %2033 = vst [vmem:[%s4073_s8 + $0x8] sm:$0xff] %v1909_v51  ;;  %v1930_v27 = vadd.f32 %v2497_v38, %v4068_v10 }
 0x51a   : > { %v1921_v34 = vpop.f32.mrf.mxu1 }
 0x51b   : > { %2038 = vst [vmem:[%s4073_s8 + $0x30] sm:$0xff] %v1930_v27  ;;  %v1922_v42 = vadd.f32 %v1921_v34, %v4068_v10 }
 0x51c   : > { %v2498_v4 = vpop.f32.mrf.mxu1 }
 0x51d   : > { %2036 = vst [vmem:[%s4073_s8 + $0x20] sm:$0xff] %v1922_v42  ;;  %v1933_v30 = vadd.f32 %v2498_v4, %v4068_v10 }
 0x51e   : > { %v1924_v54 = vpop.f32.mrf.mxu1 }
 0x51f   : > { %2039 = vst [vmem:[%s4073_s8 + $0x38] sm:$0xff] %v1933_v30  ;;  %v1925_v28 = vadd.f32 %v1924_v54, %v4068_v10 }
 0x520   : > { %v2501_v39 = vpop.f32.mrf.mxu1 }
 0x521   : > { %2037 = vst [vmem:[%s4073_s8 + $0x28] sm:$0xff] %v1925_v28  ;;  %v1946_v50 = vadd.f32 %v2501_v39, %v4068_v10 }
 0x522   : > { %v1937_v1 = vpop.f32.mrf.mxu1 }
 0x523   : > { %2042 = vst [vmem:[%s4073_s8 + $0x50] sm:$0xff] %v1946_v50  ;;  %v1938_v35 = vadd.f32 %v1937_v1, %v4068_v10 }
 0x524   : > { %v2502_v31 = vpop.f32.mrf.mxu1 }
 0x525   : > { %2040 = vst [vmem:[%s4073_s8 + $0x40] sm:$0xff] %v1938_v35  ;;  %v1949_v45 = vadd.f32 %v2502_v31, %v4068_v10 }
 0x526   : > { %v1940_v44 = vpop.f32.mrf.mxu1 }
 0x527   : > { %2043 = vst [vmem:[%s4073_s8 + $0x58] sm:$0xff] %v1949_v45  ;;  %v1941_v60 = vadd.f32 %v1940_v44, %v4068_v10 }
 0x528   : > { %v2505_v59 = vpop.f32.mrf.mxu1 }
 0x529   : > { %2041 = vst [vmem:[%s4073_s8 + $0x48] sm:$0xff] %v1941_v60  ;;  %v1962_v43 = vadd.f32 %v2505_v59, %v4068_v10 }
 0x52a   : > { %v1953_v55 = vpop.f32.mrf.mxu1 }
 0x52b   : > { %2046 = vst [vmem:[%s4073_s8 + $0x70] sm:$0xff] %v1962_v43  ;;  %v1954_v58 = vadd.f32 %v1953_v55, %v4068_v10 }
 0x52c   : > { %v2506_v8 = vpop.f32.mrf.mxu1 }
 0x52d   : > { %2044 = vst [vmem:[%s4073_s8 + $0x60] sm:$0xff] %v1954_v58  ;;  %v1965_v36 = vadd.f32 %v2506_v8, %v4068_v10 }
 0x52e   : > { %v1956_v13 = vpop.f32.mrf.mxu1 }
 0x52f   : > { %2047 = vst [vmem:[%s4073_s8 + $0x78] sm:$0xff] %v1965_v36  ;;  %v1957_v20 = vadd.f32 %v1956_v13, %v4068_v10 }
 0x530   : > { %v2509_v22 = vpop.f32.mrf.mxu1 }
 0x531   : > { %2045 = vst [vmem:[%s4073_s8 + $0x68] sm:$0xff] %v1957_v20  ;;  %v1978_v11 = vadd.f32 %v2509_v22, %v4068_v10 }
 0x532   : > { %v1969_v2 = vpop.f32.mrf.mxu1 }
 0x533   : > { %2050 = vst [vmem:[%s4073_s8 + $0x90] sm:$0xff] %v1978_v11  ;;  %v1970_v5 = vadd.f32 %v1969_v2, %v4068_v10 }
 0x534   : > { %v2510_v25 = vpop.f32.mrf.mxu1 }
 0x535   : > { %2048 = vst [vmem:[%s4073_s8 + $0x80] sm:$0xff] %v1970_v5  ;;  %v1981_v62 = vadd.f32 %v2510_v25, %v4068_v10 }
 0x536   : > { %v1972_v15 = vpop.f32.mrf.mxu1 }
 0x537   : > { %2051 = vst [vmem:[%s4073_s8 + $0x98] sm:$0xff] %v1981_v62  ;;  %v1973_v16 = vadd.f32 %v1972_v15, %v4068_v10 }
 0x538   : > { %v2513_v56 = vpop.f32.mrf.mxu1 }
 0x539   : > { %2049 = vst [vmem:[%s4073_s8 + $0x88] sm:$0xff] %v1973_v16  ;;  %v1994_v52 = vadd.f32 %v2513_v56, %v4068_v10 }
 0x53a   : > { %v1985_v29 = vpop.f32.mrf.mxu1 }
 0x53b   : > { %2054 = vst [vmem:[%s4073_s8 + $0xb0] sm:$0xff] %v1994_v52  ;;  %v1986_v0 = vadd.f32 %v1985_v29, %v4068_v10 }
 0x53c   : > { %v2514_v41 = vpop.f32.mrf.mxu1 }
 0x53d   : > { %2052 = vst [vmem:[%s4073_s8 + $0xa0] sm:$0xff] %v1986_v0  ;;  %v1997_v14 = vadd.f32 %v2514_v41, %v4068_v10 }
 0x53e   : > { %v1988_v33 = vpop.f32.mrf.mxu1 }
 0x53f   : > { %2055 = vst [vmem:[%s4073_s8 + $0xb8] sm:$0xff] %v1997_v14  ;;  %v1989_v26 = vadd.f32 %v1988_v33, %v4068_v10 }
 0x540   : > { %v2517_v49 = vpop.f32.mrf.mxu1 }
 0x541   : > { %2053 = vst [vmem:[%s4073_s8 + $0xa8] sm:$0xff] %v1989_v26  ;;  %v2010_v19 = vadd.f32 %v2517_v49, %v4068_v10 }
 0x542   : > { %v2001_v7 = vpop.f32.mrf.mxu1 }
 0x543   : > { %2058 = vst [vmem:[%s4073_s8 + $0xd0] sm:$0xff] %v2010_v19  ;;  %v2002_v48 = vadd.f32 %v2001_v7, %v4068_v10 }
 0x544   : > { %v2518_v53 = vpop.f32.mrf.mxu1 }
 0x545   : > { %2056 = vst [vmem:[%s4073_s8 + $0xc0] sm:$0xff] %v2002_v48  ;;  %v2013_v47 = vadd.f32 %v2518_v53, %v4068_v10 }
 0x546   : > { %v2004_v17 = vpop.f32.mrf.mxu1 }
 0x547   : > { %2059 = vst [vmem:[%s4073_s8 + $0xd8] sm:$0xff] %v2013_v47  ;;  %v2005_v3 = vadd.f32 %v2004_v17, %v4068_v10 }
 0x548   : > { %v2521_v40 = vpop.f32.mrf.mxu1 }
 0x549   : > { %2057 = vst [vmem:[%s4073_s8 + $0xc8] sm:$0xff] %v2005_v3  ;;  %v2026_v57 = vadd.f32 %v2521_v40, %v4068_v10 }
 0x54a   : > { %v2017_v21 = vpop.f32.mrf.mxu1 }
 0x54b   : > { %2062 = vst [vmem:[%s4073_s8 + $0xf0] sm:$0xff] %v2026_v57  ;;  %v2018_v37 = vadd.f32 %v2017_v21, %v4068_v10 }
 0x54c   : > { %v2522_v46 = vpop.f32.mrf.mxu1 }
 0x54d   : > { %2060 = vst [vmem:[%s4073_s8 + $0xe0] sm:$0xff] %v2018_v37  ;;  %v2029_v9 = vadd.f32 %v2522_v46, %v4068_v10 }
 0x54e   : > { %v2020_v32 = vpop.f32.mrf.mxu1 }
 0x54f   : > { %2063 = vst [vmem:[%s4073_s8 + $0xf8] sm:$0xff] %v2029_v9  ;;  %v2021_v24 = vadd.f32 %v2020_v32, %v4068_v10 }
 0x551   : > { %2061 = vst [vmem:[%s4073_s8 + $0xe8] sm:$0xff] %v2021_v24 }
 0x552 PF: > { %p19_p5 = scmp.ge.s32.totalorder %s3019_s19, 4   ;;  %s4172_s21 = smov %s2852_s22 }
 0x553   : > { %s4173_s22 = smov %s2856_s23  ;;  %s4174_s23 = smov %s3030_s26 }
 0x554   : > { %s4175_s24 = smov %s3019_s19  ;;  %21 = sbr.rel (!%p19_p5) target bundleno = 6 (0x6), region = 104 }
 0x559   :  { %2086 = vsyncpa [#allocation3], 1 }
 0x55a   :  { %2088 = vsyncpa [#allocation3 + $0x1], 1 }
 0x55b   :  { %2089 = vsyncpa [#allocation5], 1 }
 0x55c   :  { %2090 = vsyncpa [#allocation8], 1 }
 0x55d   :  { %2091 = vsyncpa [#allocation11], 1 }

</bundles_post_ra>
